<compile_context>
chip_gen: v7x
topology: tpu7x:2x2x1
jax: 0.10.0
libtpu: 0.0.40
codegen_flags: <defaults>
</compile_context>

<pallas_src>
import functools
import math

import jax
import jax.numpy as jnp
from jax import lax
from jax.experimental import pallas as pl
from jax.experimental.pallas import tpu as pltpu

MXU_DTYPE = jnp.bfloat16        # MXU operand dtype; accumulation stays f32
ADJ_DTYPE = jnp.bfloat16        # inter-kernel adjacency dtype (HBM traffic)


@functools.lru_cache(maxsize=1)
def _vmem_limit():
    """Generation-aware VMEM budget: ~3/4 of physical (48 MiB v7x, 96 MiB v6e/v5e)."""
    cap = 64 * 1024 * 1024
    try:
        info_cap = pltpu.get_tpu_info().vmem_capacity_bytes
        if info_cap:
            cap = int(info_cap)
    except Exception:
        pass
    return int(cap * 3 // 4)


# ----------------------------------------------------------------------------
# Small in-kernel helpers (accumulation always f32)
# ----------------------------------------------------------------------------

def _mm(a, b):      # (M,K) @ (K,N)
    return lax.dot_general(a.astype(MXU_DTYPE), b.astype(MXU_DTYPE),
                           (((1,), (0,)), ((), ())),
                           preferred_element_type=jnp.float32)


def _mm_tt(a, b):   # (M,K) , (N,K)  ->  a @ b.T
    return lax.dot_general(a.astype(MXU_DTYPE), b.astype(MXU_DTYPE),
                           (((1,), (1,)), ((), ())),
                           preferred_element_type=jnp.float32)


def _mm_tn(a, b):   # (K,M) , (K,N)  ->  a.T @ b
    return lax.dot_general(a.astype(MXU_DTYPE), b.astype(MXU_DTYPE),
                           (((0,), (0,)), ((), ())),
                           preferred_element_type=jnp.float32)


def _sum_all(x):    # (M,N) -> (1,1)
    return jnp.sum(jnp.sum(x, axis=-1, keepdims=True), axis=-2, keepdims=True)


def _stats_pack(vals):
    """Pack a tuple of (1,1) scalars into a (1,len) slab (no concat lowering)."""
    n = len(vals)
    ci = lax.broadcasted_iota(jnp.int32, (1, n), 1)
    out = jnp.zeros((1, n), jnp.float32)
    for i, v in enumerate(vals):
        out = jnp.where(ci == i, v, out)
    return out


# ----------------------------------------------------------------------------
# Linear: y = x @ W^T + b  (weights pre-padded to a 128-lane slab outside jit)
# ----------------------------------------------------------------------------

def _linear_kernel(x_ref, w_ref, b_ref, o_ref):
    o_ref[...] = _mm_tt(x_ref[...], w_ref[...]) + b_ref[...]


def pallas_linear(x, wp, bp, cout):
    """y = x @ w.T + b with w/b already lane-padded: wp (Cp,Cin), bp (1,Cp)."""
    R, Cin = x.shape
    Cp = wp.shape[0]
    TR = R if R <= 2048 else 1024            # big row tiles; full height if small
    cost = pl.CostEstimate(flops=2 * R * Cin * Cp, transcendentals=0,
                           bytes_accessed=4 * (R * Cin + Cp * Cin + R * Cp))
    out = pl.pallas_call(
        _linear_kernel,
        out_shape=jax.ShapeDtypeStruct((R, Cp), jnp.float32),
        grid=(pl.cdiv(R, TR),),
        in_specs=[
            pl.BlockSpec((TR, Cin), lambda i: (i, 0)),
            pl.BlockSpec((Cp, Cin), lambda i: (0, 0)),
            pl.BlockSpec((1, Cp), lambda i: (0, 0)),
        ],
        out_specs=pl.BlockSpec((TR, Cp), lambda i: (i, 0)),
        compiler_params=pltpu.CompilerParams(dimension_semantics=("parallel",)),
        cost_estimate=cost,
    )(x, wp, bp)
    return out if cout == Cp else out[:, :cout]


# ----------------------------------------------------------------------------
# Fused GAP-Layer + CT-Layer rewiring (one per-batch kernel, adj stays in VMEM)
# ----------------------------------------------------------------------------

def _rewire_kernel(derivative, EPS,
                   adj_ref, s0_ref, s1_ref, m_ref,
                   adjn_ref, ss_rw_ref, ss_ct_ref, stats_ref):
    adj = adj_ref[...].astype(jnp.float32)                    # (N,N)
    maskf = m_ref[...]                                        # (N,1)

    # ------- Stage 1: GAP-Layer (mincut rewiring) -------
    logits = s0_ref[...]                                      # (N,2)
    mlog = jnp.max(logits, axis=-1, keepdims=True)
    e = jnp.exp(logits - mlog)
    s = (e / jnp.sum(e, axis=-1, keepdims=True)) * maskf

    t = _mm(adj, s)                                           # A @ S        (N,2)
    num_rw = _sum_all(s * t)                                  # tr(S^T A S)
    d_flat = jnp.sum(adj, axis=-1, keepdims=True)             # degrees      (N,1)
    den_rw = _sum_all(d_flat * jnp.sum(s * s, axis=-1, keepdims=True))
    ss_rw_ref[...] = _mm_tn(s, s)                             # S^T S        (2,2)

    # Fiedler-vector approximation from the learned bipartition
    in_a = jnp.logical_and(s[:, 0:1] >= s[:, 1:2], maskf > 0.5)
    in_af = in_a.astype(jnp.float32)
    n = _sum_all(maskf)
    na = _sum_all(in_af)
    nb = n - na
    ya = jnp.sqrt(nb / (na * n + EPS))
    yb = -jnp.sqrt(na / (nb * n + EPS))
    y = jnp.where(in_a, ya, yb) * maskf                       # (N,1)

    if derivative == "normalized":
        dn = jnp.sqrt(d_flat + EPS)
        yn = jnp.where(maskf > 0.5, y / dn, 0.0)
        lam2 = num_rw / (den_rw + EPS)
        ynr = jnp.swapaxes(yn, 0, 1)
        grad = (yn - ynr) ** 2 - lam2 * (yn * yn + ynr * ynr)
    else:  # "laplacian" (default / None)
        yr = jnp.swapaxes(y, 0, 1)
        grad = (y - yr) ** 2

    adj1 = jnp.maximum(adj - adj * grad, 0.0)                 # stays in VMEM (f32)

    # ------- Stage 2: CT-Layer on the mincut-rewired adjacency -------
    s1 = s1_ref[...] * maskf                                  # (N,k)  (no softmax)
    d1 = jnp.sum(adj1, axis=-1, keepdims=True)                # (N,1)
    t1 = _mm(adj1, s1)                                        # A1 @ S1  (N,k)
    tr_as = _sum_all(s1 * t1)                                 # tr(S^T A S)
    den_ct = _sum_all(d1 * jnp.sum(s1 * s1, axis=-1, keepdims=True))
    num_ct = den_ct - tr_as                                   # tr(S^T L S)
    ss_ct_ref[...] = _mm_tn(s1, s1)

    vol = _sum_all(d1)                                        # graph volume
    z = s1 / (jnp.sqrt(den_ct) + EPS)                         # CT embedding (N,k)
    # f32 MXU operands here: avoids bf16 cancellation in the cdist.
    g = lax.dot_general(z, z, (((1,), (1,)), ((), ())),
                        preferred_element_type=jnp.float32)   # z z^T  (N,N)
    sq = jnp.sum(z * z, axis=-1, keepdims=True)               # (N,1)
    d2 = sq + jnp.swapaxes(sq, 0, 1) - 2.0 * g
    ct = jnp.sqrt(jnp.maximum(d2, 0.0)) * vol                 # commute-time distances
    adjn_ref[...] = (ct * adj1).astype(adjn_ref.dtype)        # bf16 writeback

    stats_ref[...] = _stats_pack((num_rw, den_rw, num_ct, den_ct))


def dense_rewiring(adj, s0, s1, maskf, derivative, EPS):
    B, N, _ = adj.shape
    k = s1.shape[-1]
    kern = functools.partial(_rewire_kernel, derivative, EPS)
    cost = pl.CostEstimate(
        flops=int(B * (4 * N * N * (k + 2) + 24 * N * N)),
        transcendentals=int(B * (N * N + 8 * N)),
        bytes_accessed=int(B * (4 * N * N + 4 * N * (k + 4))),
    )
    adj_new, ss_rw, ss_ct, stats = pl.pallas_call(
        kern,
        out_shape=(jax.ShapeDtypeStruct((B, N, N), ADJ_DTYPE),
                   jax.ShapeDtypeStruct((B, 2, 2), jnp.float32),
                   jax.ShapeDtypeStruct((B, k, k), jnp.float32),
                   jax.ShapeDtypeStruct((B, 1, 4), jnp.float32)),
        grid=(B,),
        in_specs=[
            pl.BlockSpec((None, N, N), lambda b: (b, 0, 0)),
            pl.BlockSpec((None, N, 2), lambda b: (b, 0, 0)),
            pl.BlockSpec((None, N, k), lambda b: (b, 0, 0)),
            pl.BlockSpec((None, N, 1), lambda b: (b, 0, 0)),
        ],
        out_specs=(
            pl.BlockSpec((None, N, N), lambda b: (b, 0, 0)),
            pl.BlockSpec((None, 2, 2), lambda b: (b, 0, 0)),
            pl.BlockSpec((None, k, k), lambda b: (b, 0, 0)),
            pl.BlockSpec((None, 1, 4), lambda b: (b, 0, 0)),
        ),
        compiler_params=pltpu.CompilerParams(
            dimension_semantics=("parallel",), vmem_limit_bytes=_vmem_limit()),
        cost_estimate=cost,
    )(adj, s0, s1, maskf)
    num_rw, den_rw = stats[:, 0, 0], stats[:, 0, 1]
    num_ct, den_ct = stats[:, 0, 2], stats[:, 0, 3]
    mincut_loss_rw = jnp.mean(-(num_rw / (den_rw + EPS)))
    ct_loss = jnp.mean(num_ct / (den_ct + EPS))
    return (adj_new, mincut_loss_rw, _ortho_loss(ss_rw, 2),
            ct_loss, _ortho_loss(ss_ct, k))


# ----------------------------------------------------------------------------
# Fused conv1 + pool_mc:  h = lin_rel(A@X) + lin_root(X);  s2 = lin_mc(h)
# ----------------------------------------------------------------------------

def _conv1_poolmc_kernel(adj_ref, x_ref, wrel_ref, brel_ref, wroot_ref,
                         wmc_ref, bmc_ref, h_ref, s2_ref):
    adj = adj_ref[...]                                        # bf16 (N,N)
    x = x_ref[...]
    agg = _mm(adj, x)                                         # A @ X
    h = _mm_tt(agg, wrel_ref[...]) + brel_ref[...] + _mm_tt(x, wroot_ref[...])
    h_ref[...] = h
    s2_ref[...] = _mm_tt(h, wmc_ref[...]) + bmc_ref[...]      # pool_mc fused


def dense_graph_conv_poolmc(x, adj, p_rel, p_root, p_mc):
    B, N, H = x.shape
    w_rel, b_rel = p_rel
    w_root, _ = p_root                                        # root Linear has no bias
    w_mc, b_mc = p_mc
    k2 = w_mc.shape[0]
    cost = pl.CostEstimate(
        flops=int(B * (2 * N * N * H + 4 * N * H * H + 2 * N * H * k2)),
        transcendentals=0,
        bytes_accessed=int(B * (2 * N * N + 8 * N * H + 4 * N * k2)),
    )
    h, s2 = pl.pallas_call(
        _conv1_poolmc_kernel,
        out_shape=(jax.ShapeDtypeStruct((B, N, H), jnp.float32),
                   jax.ShapeDtypeStruct((B, N, k2), jnp.float32)),
        grid=(B,),
        in_specs=[
            pl.BlockSpec((None, N, N), lambda b: (b, 0, 0)),
            pl.BlockSpec((None, N, H), lambda b: (b, 0, 0)),
            pl.BlockSpec((H, H), lambda b: (0, 0)),
            pl.BlockSpec((1, H), lambda b: (0, 0)),
            pl.BlockSpec((H, H), lambda b: (0, 0)),
            pl.BlockSpec((k2, H), lambda b: (0, 0)),
            pl.BlockSpec((1, k2), lambda b: (0, 0)),
        ],
        out_specs=(
            pl.BlockSpec((None, N, H), lambda b: (b, 0, 0)),
            pl.BlockSpec((None, N, k2), lambda b: (b, 0, 0)),
        ),
        compiler_params=pltpu.CompilerParams(
            dimension_semantics=("parallel",), vmem_limit_bytes=_vmem_limit()),
        cost_estimate=cost,
    )(adj, x, w_rel, b_rel.reshape(1, H), w_root, w_mc, b_mc.reshape(1, k2))
    return h, s2


# ----------------------------------------------------------------------------
# Fused dense_mincut_pool + conv2 + node-sum readout
# (pooled x and out_adj never leave VMEM; kernel emits only the (1,H) readout)
# ----------------------------------------------------------------------------

def _pool_conv2_kernel(EPS, adj_ref, x_ref, s_ref, m_ref,
                       wrel_ref, brel_ref, wroot_ref,
                       hsum_ref, ss_ref, stats_ref):
    adj = adj_ref[...]                                        # bf16 (N,N)
    maskf = m_ref[...]                                        # (N,1)
    x = x_ref[...] * maskf                                    # (N,H)
    logits = s_ref[...]                                       # (N,k)

    mlog = jnp.max(logits, axis=-1, keepdims=True)
    e = jnp.exp(logits - mlog)
    s = (e / jnp.sum(e, axis=-1, keepdims=True)) * maskf

    out = _mm_tn(s, x)                                        # S^T X   (k,H)
    t = _mm(adj, s)                                           # A @ S   (N,k)
    out_adj = _mm_tn(s, t)                                    # S^T A S (k,k)

    num = _sum_all(s * t)                                     # tr(S^T A S)
    d_flat = jnp.sum(adj.astype(jnp.float32), axis=-1, keepdims=True)
    den = _sum_all(d_flat * jnp.sum(s * s, axis=-1, keepdims=True))
    ss_ref[...] = _mm_tn(s, s)
    stats_ref[...] = _stats_pack((num, den))

    # zero the diagonal, then symmetric degree normalization
    k = out_adj.shape[0]
    ri = lax.broadcasted_iota(jnp.int32, (k, k), 0)
    ci = lax.broadcasted_iota(jnp.int32, (k, k), 1)
    out_adj_z = jnp.where(ri == ci, 0.0, out_adj)
    dc = jnp.sqrt(jnp.sum(out_adj_z, axis=-1, keepdims=True)) + EPS   # (k,1)
    adj_p = out_adj_z / jnp.swapaxes(dc, 0, 1) / dc

    # conv2 fused with the node-sum readout
    agg2 = _mm(adj_p, out)                                    # A' @ X'  (k,H)
    h2 = _mm_tt(agg2, wrel_ref[...]) + brel_ref[...] + _mm_tt(out, wroot_ref[...])
    hsum_ref[...] = jnp.sum(h2, axis=0, keepdims=True)        # (1,H)


def dense_mincut_pool_conv2(x, adj, s, maskf, p_rel, p_root, EPS):
    B, N, H = x.shape
    k = s.shape[-1]
    w_rel, b_rel = p_rel
    w_root, _ = p_root
    kern = functools.partial(_pool_conv2_kernel, EPS)
    cost = pl.CostEstimate(
        flops=int(B * (2 * N * N * k + 6 * N * k * H + 4 * k * H * H + 8 * N * k)),
        transcendentals=int(B * (2 * N * k + 2 * k)),
        bytes_accessed=int(B * (2 * N * N + 4 * N * (H + k + 1) + 4 * H)),
    )
    hsum, ss, stats = pl.pallas_call(
        kern,
        out_shape=(jax.ShapeDtypeStruct((B, 1, H), jnp.float32),
                   jax.ShapeDtypeStruct((B, k, k), jnp.float32),
                   jax.ShapeDtypeStruct((B, 1, 2), jnp.float32)),
        grid=(B,),
        in_specs=[
            pl.BlockSpec((None, N, N), lambda b: (b, 0, 0)),
            pl.BlockSpec((None, N, H), lambda b: (b, 0, 0)),
            pl.BlockSpec((None, N, k), lambda b: (b, 0, 0)),
            pl.BlockSpec((None, N, 1), lambda b: (b, 0, 0)),
            pl.BlockSpec((H, H), lambda b: (0, 0)),
            pl.BlockSpec((1, H), lambda b: (0, 0)),
            pl.BlockSpec((H, H), lambda b: (0, 0)),
        ],
        out_specs=(
            pl.BlockSpec((None, 1, H), lambda b: (b, 0, 0)),
            pl.BlockSpec((None, k, k), lambda b: (b, 0, 0)),
            pl.BlockSpec((None, 1, 2), lambda b: (b, 0, 0)),
        ),
        compiler_params=pltpu.CompilerParams(
            dimension_semantics=("parallel",), vmem_limit_bytes=_vmem_limit()),
        cost_estimate=cost,
    )(adj, x, s, maskf, w_rel, b_rel.reshape(1, H), w_root)
    num, den = stats[:, 0, 0], stats[:, 0, 1]
    mincut_loss = jnp.mean(-(num / (den + EPS)))
    return hsum[:, 0, :], mincut_loss, _ortho_loss(ss, k)


# ----------------------------------------------------------------------------
# Plain-JAX glue (scatters, tiny reductions, readout head)
# ----------------------------------------------------------------------------

def _ortho_loss(ss, k):
    i_s = jnp.eye(k, dtype=ss.dtype)
    ss_n = jnp.linalg.norm(ss, axis=(-2, -1), keepdims=True)
    return jnp.mean(
        jnp.linalg.norm(ss / ss_n - i_s / jnp.linalg.norm(i_s), axis=(-2, -1)))


def to_dense_batch(x, batch, B, Nmax):
    # NOTE: assumes node indices are sorted by batch (as in PyG DataLoader output)
    n_total = x.shape[0]
    counts = jnp.zeros((B,), jnp.int32).at[batch].add(jnp.ones((n_total,), jnp.int32))
    offsets = jnp.concatenate([jnp.zeros((1,), jnp.int32), jnp.cumsum(counts)[:-1]])
    pos = jnp.arange(n_total, dtype=jnp.int32) - offsets[batch]
    dense = jnp.zeros((B, Nmax, x.shape[1]), x.dtype).at[batch, pos].set(x)
    mask = jnp.zeros((B, Nmax), bool).at[batch, pos].set(True)
    return dense, mask, pos


def to_dense_adj(edge_index, batch, pos, B, Nmax):
    row, col = edge_index[0], edge_index[1]
    b = batch[row]
    return jnp.zeros((B, Nmax, Nmax), jnp.float32).at[b, pos[row], pos[col]].add(1.0)


# ----------------------------------------------------------------------------
# Parameters & forward pass
# ----------------------------------------------------------------------------

def _init_linear(key, cin, cout, bias=True):
    k1, k2 = jax.random.split(key)
    bound = 1.0 / math.sqrt(cin)
    w = jax.random.uniform(k1, (cout, cin), jnp.float32, minval=-bound, maxval=bound)
    if bias:
        b = jax.random.uniform(k2, (cout,), jnp.float32, minval=-bound, maxval=bound)
    else:
        b = jnp.zeros((cout,), jnp.float32)
    return w, b


def init_params(key, in_ch, hidden, out_ch, k_centers):
    ks = jax.random.split(key, 10)
    return {
        "lin1": _init_linear(ks[0], in_ch, hidden),
        "pool_rw": _init_linear(ks[1], hidden, 2),
        "pool_ct": _init_linear(ks[2], hidden, k_centers),
        "conv1_rel": _init_linear(ks[3], hidden, hidden),
        "conv1_root": _init_linear(ks[4], hidden, hidden, bias=False),
        "pool_mc": _init_linear(ks[5], hidden, 16),
        "conv2_rel": _init_linear(ks[6], hidden, hidden),
        "conv2_root": _init_linear(ks[7], hidden, hidden, bias=False),
        "lin2": _init_linear(ks[8], hidden, hidden),
        "lin3": _init_linear(ks[9], hidden, out_ch),
    }


def _pad_linear(w, b):
    """Lane-pad (Cout,Cin) weight / (Cout,) bias to a 128-multiple output slab."""
    cout, cin = w.shape
    cp = ((cout + 127) // 128) * 128
    wp = jnp.zeros((cp, cin), jnp.float32).at[:cout].set(w.astype(jnp.float32))
    bp = jnp.zeros((1, cp), jnp.float32).at[0, :cout].set(b.astype(jnp.float32))
    return wp, bp


def preprocess_params(params):
    """One-time (outside jit) weight padding / head fusion."""
    pp = dict(params)
    pp["lin1_p"] = _pad_linear(*params["lin1"])
    w_rw, b_rw = params["pool_rw"]
    w_ct, b_ct = params["pool_ct"]
    pp["pool_rwct_p"] = _pad_linear(jnp.concatenate([w_rw, w_ct], axis=0),
                                    jnp.concatenate([b_rw, b_ct], axis=0))
    return pp


def diffwire_forward(pp, x, edge_index, batch, *, B, Nmax,
                     derivative=None, EPS=1e-15):
    xd, mask, pos = to_dense_batch(x, batch, B, Nmax)
    # 0/1 adjacency is exact in bf16 -> carry all adjacency HBM traffic in bf16
    adj = to_dense_adj(edge_index, batch, pos, B, Nmax).astype(ADJ_DTYPE)
    maskf = mask.astype(jnp.float32)[..., None]                      # (B, N, 1)

    hidden = pp["conv1_rel"][0].shape[0]
    k_ct = pp["pool_ct"][0].shape[0]

    R = B * Nmax
    in_ch = xd.shape[-1]
    h = pallas_linear(xd.reshape(R, in_ch), *pp["lin1_p"],
                      cout=hidden).reshape(B, Nmax, hidden)

    # pool_rw + pool_ct share the same input -> one fused, lane-dense linear
    s_cat = pallas_linear(h.reshape(R, hidden), *pp["pool_rwct_p"],
                          cout=2 + k_ct).reshape(B, Nmax, 2 + k_ct)
    s0 = s_cat[..., :2]
    s1 = s_cat[..., 2:2 + k_ct]

    # GAP-Layer + CT-Layer fused in one per-batch kernel (adj resident in VMEM)
    adj, mincut_loss_rw, ortho_loss_rw, ct_loss, ortho_loss_ct = dense_rewiring(
        adj, s0, s1, maskf, derivative, EPS)

    # conv1 with the pool_mc linear fused
    h, s2 = dense_graph_conv_poolmc(h, adj, pp["conv1_rel"], pp["conv1_root"],
                                    pp["pool_mc"])

    # mincut pool + conv2 + node-sum readout fused -> (B, H)
    hsum, mincut_loss, ortho_loss_mc = dense_mincut_pool_conv2(
        h, adj, s2, maskf, pp["conv2_rel"], pp["conv2_root"], EPS)

    # tiny MLP head kept in plain JAX (too small for the MXU)
    w2, b2 = pp["lin2"]
    w3, b3 = pp["lin3"]
    hh = jnp.maximum(hsum @ w2.T + b2, 0.0)
    logits = hh @ w3.T + b3
    logp = jax.nn.log_softmax(logits, axis=-1)

    main_loss = mincut_loss_rw + ct_loss + mincut_loss
    ortho_loss = ortho_loss_rw + ortho_loss_ct + ortho_loss_mc
    return logp, main_loss, ortho_loss


# ----------------------------------------------------------------------------
# Main
# ----------------------------------------------------------------------------

if __name__ == "__main__":
    key = jax.random.PRNGKey(0)
    in_channels, hidden, out_channels, k_centers = 4, 32, 6, 8

    # Two small graphs (ring + chord edges), sizes 12 and 16 -> Nmax = 16.
    sizes = [12, 16]
    B, Nmax = len(sizes), max(sizes)
    edges = []
    off = 0
    for n in sizes:
        for i in range(n):
            for step in (1, 3):
                j = (i + step) % n
                edges.append((off + i, off + j))
                edges.append((off + j, off + i))
        off += n
    edge_index = jnp.array(edges, dtype=jnp.int32).T                 # (2, E)
    batch = jnp.array(
        [g for g, n in enumerate(sizes) for _ in range(n)], dtype=jnp.int32)

    kx, kp = jax.random.split(key)
    x = jax.random.normal(kx, (sum(sizes), in_channels), jnp.float32)
    params = init_params(kp, in_channels, hidden, out_channels, k_centers)
    pp = preprocess_params(params)          # one-time lane-padding, outside jit

    fwd = jax.jit(functools.partial(diffwire_forward, B=B, Nmax=Nmax,
                                    derivative=None, EPS=1e-15))
    logp, main_loss, ortho_loss = fwd(pp, x, edge_index, batch)
    jax.block_until_ready((logp, main_loss, ortho_loss))

    assert logp.shape == (B, out_channels)
    assert bool(jnp.all(jnp.isfinite(logp)))
    assert bool(jnp.isfinite(main_loss)) and bool(jnp.isfinite(ortho_loss))
    print("KERNEL_OK")
</pallas_src>

<mosaic_0001>
module attributes {stable_mosaic.version = 11 : i64} {
  func.func private @main(%arg0: i32) attributes {dimension_semantics = [#tpu.dimension_semantics<core_parallel>], iteration_bounds = array<i64: 2>, tpu.core_type = #tpu.core_type<sc_scalar_subcore>, window_params = []} {
    return
  }
}

module attributes {stable_mosaic.version = 11 : i64} {
  func.func private @main(%arg0: i32) attributes {dimension_semantics = [#tpu.dimension_semantics<core_parallel>], iteration_bounds = array<i64: 2>, tpu.core_type = #tpu.core_type<sc_scalar_subcore>, window_params = []} {
    return
  }
}

module attributes {stable_mosaic.version = 11 : i64} {
  func.func @_linear_kernel(%arg0: i32, %arg1: memref<32x4xf32, #tpu.memory_space<vmem>>, %arg2: memref<128x4xf32, #tpu.memory_space<vmem>>, %arg3: memref<1x128xf32, #tpu.memory_space<vmem>>, %arg4: memref<32x128xf32, #tpu.memory_space<vmem>>) attributes {dimension_semantics = [#tpu.dimension_semantics<parallel>], iteration_bounds = array<i64: 1>, scalar_prefetch = 0 : i64, scratch_operands = 0 : i64, tpu.core_type = #tpu.core_type<tc>, window_params = [{transform_indices = @transform_0, window_bounds = array<i64: 32, 4>}, {pipeline_mode = #tpu.pipeline_mode<synchronous>, transform_indices = @transform_1, window_bounds = array<i64: 128, 4>}, {pipeline_mode = #tpu.pipeline_mode<synchronous>, transform_indices = @transform_2, window_bounds = array<i64: 1, 128>}, {transform_indices = @transform_3, window_bounds = array<i64: 32, 128>}]} {
    %c0 = arith.constant 0 : index
    %c0_0 = arith.constant 0 : index
    %0 = vector.load %arg1[%c0, %c0_0] : memref<32x4xf32, #tpu.memory_space<vmem>>, vector<32x4xf32>
    %c0_1 = arith.constant 0 : index
    %c0_2 = arith.constant 0 : index
    %1 = vector.load %arg2[%c0_1, %c0_2] : memref<128x4xf32, #tpu.memory_space<vmem>>, vector<128x4xf32>
    %2 = arith.truncf %0 : vector<32x4xf32> to vector<32x4xbf16>
    %3 = arith.truncf %1 : vector<128x4xf32> to vector<128x4xbf16>
    %cst = arith.constant dense<0.000000e+00> : vector<32x128xf32>
    %4 = tpu.matmul %2, %3, %cst {dimension_numbers = #tpu.dot_dimension_numbers<[1], [1], [0], [0], [0, 0, 1, 0], [], []>} : vector<32x4xbf16>, vector<128x4xbf16>, vector<32x128xf32> -> vector<32x128xf32>
    %c0_3 = arith.constant 0 : index
    %c0_4 = arith.constant 0 : index
    %5 = vector.load %arg3[%c0_3, %c0_4] : memref<1x128xf32, #tpu.memory_space<vmem>>, vector<1x128xf32>
    %6 = vector.broadcast %5 : vector<1x128xf32> to vector<32x128xf32>
    %7 = arith.addf %4, %6 : vector<32x128xf32>
    %c0_5 = arith.constant 0 : index
    %c0_6 = arith.constant 0 : index
    %8 = vector.load %arg4[%c0_5, %c0_6] : memref<32x128xf32, #tpu.memory_space<vmem>>, vector<32x128xf32>
    tpu.vector_store %arg4[%c0_5, %c0_6], %7 {strides = array<i32>} : memref<32x128xf32, #tpu.memory_space<vmem>>, vector<32x128xf32>,
    return
  }
  func.func @transform_0(%arg0: i32) -> (i32, i32) {
    %c0_i32 = arith.constant 0 : i32
    %c0_i32_0 = arith.constant 0 : i32
    return %arg0, %c0_i32 : i32, i32
  }
  func.func @transform_1(%arg0: i32) -> (i32, i32) {
    %c0_i32 = arith.constant 0 : i32
    %c0_i32_0 = arith.constant 0 : i32
    %c0_i32_1 = arith.constant 0 : i32
    return %c0_i32, %c0_i32_0 : i32, i32
  }
  func.func @transform_2(%arg0: i32) -> (i32, i32) {
    %c0_i32 = arith.constant 0 : i32
    %c0_i32_0 = arith.constant 0 : i32
    %c0_i32_1 = arith.constant 0 : i32
    return %c0_i32, %c0_i32_0 : i32, i32
  }
  func.func @transform_3(%arg0: i32) -> (i32, i32) {
    %c0_i32 = arith.constant 0 : i32
    %c0_i32_0 = arith.constant 0 : i32
    return %arg0, %c0_i32 : i32, i32
  }
}

module attributes {stable_mosaic.version = 11 : i64} {
  func.func @_linear_kernel(%arg0: i32, %arg1: memref<32x32xf32, #tpu.memory_space<vmem>>, %arg2: memref<128x32xf32, #tpu.memory_space<vmem>>, %arg3: memref<1x128xf32, #tpu.memory_space<vmem>>, %arg4: memref<32x128xf32, #tpu.memory_space<vmem>>) attributes {dimension_semantics = [#tpu.dimension_semantics<parallel>], iteration_bounds = array<i64: 1>, scalar_prefetch = 0 : i64, scratch_operands = 0 : i64, tpu.core_type = #tpu.core_type<tc>, window_params = [{transform_indices = @transform_0, window_bounds = array<i64: 32, 32>}, {pipeline_mode = #tpu.pipeline_mode<synchronous>, transform_indices = @transform_1, window_bounds = array<i64: 128, 32>}, {pipeline_mode = #tpu.pipeline_mode<synchronous>, transform_indices = @transform_2, window_bounds = array<i64: 1, 128>}, {transform_indices = @transform_3, window_bounds = array<i64: 32, 128>}]} {
    %c0 = arith.constant 0 : index
    %c0_0 = arith.constant 0 : index
    %0 = vector.load %arg1[%c0, %c0_0] : memref<32x32xf32, #tpu.memory_space<vmem>>, vector<32x32xf32>
    %c0_1 = arith.constant 0 : index
    %c0_2 = arith.constant 0 : index
    %1 = vector.load %arg2[%c0_1, %c0_2] : memref<128x32xf32, #tpu.memory_space<vmem>>, vector<128x32xf32>
    %2 = arith.truncf %0 : vector<32x32xf32> to vector<32x32xbf16>
    %3 = arith.truncf %1 : vector<128x32xf32> to vector<128x32xbf16>
    %cst = arith.constant dense<0.000000e+00> : vector<32x128xf32>
    %4 = tpu.matmul %2, %3, %cst {dimension_numbers = #tpu.dot_dimension_numbers<[1], [1], [0], [0], [0, 0, 1, 0], [], []>} : vector<32x32xbf16>, vector<128x32xbf16>, vector<32x128xf32> -> vector<32x128xf32>
    %c0_3 = arith.constant 0 : index
    %c0_4 = arith.constant 0 : index
    %5 = vector.load %arg3[%c0_3, %c0_4] : memref<1x128xf32, #tpu.memory_space<vmem>>, vector<1x128xf32>
    %6 = vector.broadcast %5 : vector<1x128xf32> to vector<32x128xf32>
    %7 = arith.addf %4, %6 : vector<32x128xf32>
    %c0_5 = arith.constant 0 : index
    %c0_6 = arith.constant 0 : index
    %8 = vector.load %arg4[%c0_5, %c0_6] : memref<32x128xf32, #tpu.memory_space<vmem>>, vector<32x128xf32>
    tpu.vector_store %arg4[%c0_5, %c0_6], %7 {strides = array<i32>} : memref<32x128xf32, #tpu.memory_space<vmem>>, vector<32x128xf32>,
    return
  }
  func.func @transform_0(%arg0: i32) -> (i32, i32) {
    %c0_i32 = arith.constant 0 : i32
    %c0_i32_0 = arith.constant 0 : i32
    return %arg0, %c0_i32 : i32, i32
  }
  func.func @transform_1(%arg0: i32) -> (i32, i32) {
    %c0_i32 = arith.constant 0 : i32
    %c0_i32_0 = arith.constant 0 : i32
    %c0_i32_1 = arith.constant 0 : i32
    return %c0_i32, %c0_i32_0 : i32, i32
  }
  func.func @transform_2(%arg0: i32) -> (i32, i32) {
    %c0_i32 = arith.constant 0 : i32
    %c0_i32_0 = arith.constant 0 : i32
    %c0_i32_1 = arith.constant 0 : i32
    return %c0_i32, %c0_i32_0 : i32, i32
  }
  func.func @transform_3(%arg0: i32) -> (i32, i32) {
    %c0_i32 = arith.constant 0 : i32
    %c0_i32_0 = arith.constant 0 : i32
    return %arg0, %c0_i32 : i32, i32
  }
}

module attributes {stable_mosaic.version = 11 : i64} {
  func.func @_rewire_kernel(%arg0: i32, %arg1: memref<1x16x16xbf16, #tpu.memory_space<vmem>>, %arg2: memref<1x16x2xf32, #tpu.memory_space<vmem>>, %arg3: memref<1x16x8xf32, #tpu.memory_space<vmem>>, %arg4: memref<1x16x1xf32, #tpu.memory_space<vmem>>, %arg5: memref<1x16x16xbf16, #tpu.memory_space<vmem>>, %arg6: memref<1x2x2xf32, #tpu.memory_space<vmem>>, %arg7: memref<1x8x8xf32, #tpu.memory_space<vmem>>, %arg8: memref<1x1x4xf32, #tpu.memory_space<vmem>>) attributes {dimension_semantics = [#tpu.dimension_semantics<parallel>], iteration_bounds = array<i64: 2>, scalar_prefetch = 0 : i64, scratch_operands = 0 : i64, tpu.core_type = #tpu.core_type<tc>, window_params = [{transform_indices = @transform_0, window_bounds = array<i64: 1, 16, 16>}, {transform_indices = @transform_1, window_bounds = array<i64: 1, 16, 2>}, {transform_indices = @transform_2, window_bounds = array<i64: 1, 16, 8>}, {transform_indices = @transform_3, window_bounds = array<i64: 1, 16, 1>}, {transform_indices = @transform_4, window_bounds = array<i64: 1, 16, 16>}, {transform_indices = @transform_5, window_bounds = array<i64: 1, 2, 2>}, {transform_indices = @transform_6, window_bounds = array<i64: 1, 8, 8>}, {transform_indices = @transform_7, window_bounds = array<i64: 1, 1, 4>}]} {
    %c0 = arith.constant 0 : index
    %c0_0 = arith.constant 0 : index
    %c0_1 = arith.constant 0 : index
    %0 = vector.load %arg1[%c0, %c0_0, %c0_1] : memref<1x16x16xbf16, #tpu.memory_space<vmem>>, vector<1x16x16xbf16>
    %1 = vector.shape_cast %0 : vector<1x16x16xbf16> to vector<16x16xbf16>
    %2 = arith.extf %1 : vector<16x16xbf16> to vector<16x16xf32>
    %c0_2 = arith.constant 0 : index
    %c0_3 = arith.constant 0 : index
    %c0_4 = arith.constant 0 : index
    %3 = vector.load %arg4[%c0_2, %c0_3, %c0_4] : memref<1x16x1xf32, #tpu.memory_space<vmem>>, vector<1x16x1xf32>
    %4 = vector.shape_cast %3 : vector<1x16x1xf32> to vector<16x1xf32>
    %c0_5 = arith.constant 0 : index
    %c0_6 = arith.constant 0 : index
    %c0_7 = arith.constant 0 : index
    %5 = vector.load %arg2[%c0_5, %c0_6, %c0_7] : memref<1x16x2xf32, #tpu.memory_space<vmem>>, vector<1x16x2xf32>
    %6 = vector.shape_cast %5 : vector<1x16x2xf32> to vector<16x2xf32>
    %cst = arith.constant dense<0xFF800000> : vector<16xf32>
    %7 = vector.multi_reduction <maximumf>, %6, %cst [1] : vector<16x2xf32> to vector<16xf32>
    %8 = vector.shape_cast %7 : vector<16xf32> to vector<16x1xf32>
    %9 = vector.broadcast %8 : vector<16x1xf32> to vector<16x2xf32>
    %10 = arith.subf %6, %9 : vector<16x2xf32>
    %11 = math.exp %10 : vector<16x2xf32>
    %cst_8 = arith.constant dense<0.000000e+00> : vector<16xf32>
    %12 = vector.multi_reduction <add>, %11, %cst_8 [1] : vector<16x2xf32> to vector<16xf32>
    %13 = vector.shape_cast %12 : vector<16xf32> to vector<16x1xf32>
    %14 = vector.broadcast %13 : vector<16x1xf32> to vector<16x2xf32>
    %15 = arith.divf %11, %14 : vector<16x2xf32>
    %16 = vector.broadcast %4 : vector<16x1xf32> to vector<16x2xf32>
    %17 = arith.mulf %15, %16 : vector<16x2xf32>
    %18 = arith.truncf %2 : vector<16x16xf32> to vector<16x16xbf16>
    %19 = arith.truncf %17 : vector<16x2xf32> to vector<16x2xbf16>
    %cst_9 = arith.constant dense<0.000000e+00> : vector<16x2xf32>
    %20 = tpu.matmul %18, %19, %cst_9 {dimension_numbers = #tpu.dot_dimension_numbers<[1], [0], [0], [1], [0, 0, 1, 1], [], []>} : vector<16x16xbf16>, vector<16x2xbf16>, vector<16x2xf32> -> vector<16x2xf32>
    %21 = arith.mulf %17, %20 : vector<16x2xf32>
    %cst_10 = arith.constant dense<0.000000e+00> : vector<16xf32>
    %22 = vector.multi_reduction <add>, %21, %cst_10 [1] : vector<16x2xf32> to vector<16xf32>
    %23 = vector.shape_cast %22 : vector<16xf32> to vector<16x1xf32>
    %cst_11 = arith.constant dense<0.000000e+00> : vector<1xf32>
    %24 = vector.multi_reduction <add>, %23, %cst_11 [0] : vector<16x1xf32> to vector<1xf32>
    %25 = vector.shape_cast %24 : vector<1xf32> to vector<1x1xf32>
    %cst_12 = arith.constant dense<0.000000e+00> : vector<16xf32>
    %26 = vector.multi_reduction <add>, %2, %cst_12 [1] : vector<16x16xf32> to vector<16xf32>
    %27 = vector.shape_cast %26 : vector<16xf32> to vector<16x1xf32>
    %28 = arith.mulf %17, %17 : vector<16x2xf32>
    %cst_13 = arith.constant dense<0.000000e+00> : vector<16xf32>
    %29 = vector.multi_reduction <add>, %28, %cst_13 [1] : vector<16x2xf32> to vector<16xf32>
    %30 = vector.shape_cast %29 : vector<16xf32> to vector<16x1xf32>
    %31 = arith.mulf %27, %30 : vector<16x1xf32>
    %cst_14 = arith.constant dense<0.000000e+00> : vector<16xf32>
    %32 = vector.multi_reduction <add>, %31, %cst_14 [1] : vector<16x1xf32> to vector<16xf32>
    %33 = vector.shape_cast %32 : vector<16xf32> to vector<16x1xf32>
    %cst_15 = arith.constant dense<0.000000e+00> : vector<1xf32>
    %34 = vector.multi_reduction <add>, %33, %cst_15 [0] : vector<16x1xf32> to vector<1xf32>
    %35 = vector.shape_cast %34 : vector<1xf32> to vector<1x1xf32>
    %36 = arith.truncf %17 : vector<16x2xf32> to vector<16x2xbf16>
    %37 = arith.truncf %17 : vector<16x2xf32> to vector<16x2xbf16>
    %cst_16 = arith.constant dense<0.000000e+00> : vector<2x2xf32>
    %38 = tpu.matmul %36, %37, %cst_16 {dimension_numbers = #tpu.dot_dimension_numbers<[0], [0], [1], [1], [0, 1, 1, 1], [], []>} : vector<16x2xbf16>, vector<16x2xbf16>, vector<2x2xf32> -> vector<2x2xf32>
    %c0_17 = arith.constant 0 : index
    %c0_18 = arith.constant 0 : index
    %c0_19 = arith.constant 0 : index
    %39 = vector.load %arg6[%c0_17, %c0_18, %c0_19] : memref<1x2x2xf32, #tpu.memory_space<vmem>>, vector<1x2x2xf32>
    %40 = vector.shape_cast %39 : vector<1x2x2xf32> to vector<2x2xf32>
    %41 = vector.shape_cast %38 : vector<2x2xf32> to vector<1x2x2xf32>
    tpu.vector_store %arg6[%c0_17, %c0_18, %c0_19], %41 {strides = array<i32>} : memref<1x2x2xf32, #tpu.memory_space<vmem>>, vector<1x2x2xf32>,
    %42 = vector.extract_strided_slice %17 {offsets = [0, 0], sizes = [16, 1], strides = [1, 1]} : vector<16x2xf32> to vector<16x1xf32>
    %43 = vector.extract_strided_slice %17 {offsets = [0, 1], sizes = [16, 1], strides = [1, 1]} : vector<16x2xf32> to vector<16x1xf32>
    %44 = arith.cmpf oge, %42, %43 : vector<16x1xf32>
    %cst_20 = arith.constant 5.000000e-01 : f32
    %45 = vector.broadcast %cst_20 : f32 to vector<16x1xf32>
    %46 = arith.cmpf ogt, %4, %45 : vector<16x1xf32>
    %47 = arith.andi %44, %46 : vector<16x1xi1>
    %48 = arith.extui %47 : vector<16x1xi1> to vector<16x1xi32>
    %49 = arith.sitofp %48 : vector<16x1xi32> to vector<16x1xf32>
    %cst_21 = arith.constant dense<0.000000e+00> : vector<16xf32>
    %50 = vector.multi_reduction <add>, %4, %cst_21 [1] : vector<16x1xf32> to vector<16xf32>
    %51 = vector.shape_cast %50 : vector<16xf32> to vector<16x1xf32>
    %cst_22 = arith.constant dense<0.000000e+00> : vector<1xf32>
    %52 = vector.multi_reduction <add>, %51, %cst_22 [0] : vector<16x1xf32> to vector<1xf32>
    %53 = vector.shape_cast %52 : vector<1xf32> to vector<1x1xf32>
    %cst_23 = arith.constant dense<0.000000e+00> : vector<16xf32>
    %54 = vector.multi_reduction <add>, %49, %cst_23 [1] : vector<16x1xf32> to vector<16xf32>
    %55 = vector.shape_cast %54 : vector<16xf32> to vector<16x1xf32>
    %cst_24 = arith.constant dense<0.000000e+00> : vector<1xf32>
    %56 = vector.multi_reduction <add>, %55, %cst_24 [0] : vector<16x1xf32> to vector<1xf32>
    %57 = vector.shape_cast %56 : vector<1xf32> to vector<1x1xf32>
    %58 = arith.subf %53, %57 : vector<1x1xf32>
    %59 = arith.mulf %57, %53 : vector<1x1xf32>
    %cst_25 = arith.constant 1.000000e-15 : f32
    %60 = vector.broadcast %cst_25 : f32 to vector<1x1xf32>
    %61 = arith.addf %59, %60 : vector<1x1xf32>
    %62 = arith.divf %58, %61 : vector<1x1xf32>
    %63 = math.sqrt %62 : vector<1x1xf32>
    %64 = arith.mulf %58, %53 : vector<1x1xf32>
    %cst_26 = arith.constant 1.000000e-15 : f32
    %65 = vector.broadcast %cst_26 : f32 to vector<1x1xf32>
    %66 = arith.addf %64, %65 : vector<1x1xf32>
    %67 = arith.divf %57, %66 : vector<1x1xf32>
    %68 = math.sqrt %67 : vector<1x1xf32>
    %cst_27 = arith.constant 0.000000e+00 : f32
    %69 = vector.broadcast %cst_27 : f32 to vector<1x1xf32>
    %70 = arith.subf %69, %68 : vector<1x1xf32>
    %71 = vector.shape_cast %63 : vector<1x1xf32> to vector<1x1xf32>
    %72 = vector.broadcast %71 : vector<1x1xf32> to vector<16x1xf32>
    %73 = vector.shape_cast %70 : vector<1x1xf32> to vector<1x1xf32>
    %74 = vector.broadcast %73 : vector<1x1xf32> to vector<16x1xf32>
    %75 = arith.select %47, %72, %74 : vector<16x1xi1>, vector<16x1xf32>
    %76 = arith.mulf %75, %4 : vector<16x1xf32>
    %77 = tpu.transpose %76, [1, 0] : vector<16x1xf32> -> vector<1x16xf32>
    %78 = vector.broadcast %76 : vector<16x1xf32> to vector<16x16xf32>
    %79 = vector.broadcast %77 : vector<1x16xf32> to vector<16x16xf32>
    %80 = arith.subf %78, %79 : vector<16x16xf32>
    %81 = arith.mulf %80, %80 : vector<16x16xf32>
    %82 = arith.mulf %2, %81 : vector<16x16xf32>
    %83 = arith.subf %2, %82 : vector<16x16xf32>
    %cst_28 = arith.constant 0.000000e+00 : f32
    %84 = vector.broadcast %cst_28 : f32 to vector<16x16xf32>
    %85 = arith.maximumf %83, %84 : vector<16x16xf32>
    %c0_29 = arith.constant 0 : index
    %c0_30 = arith.constant 0 : index
    %c0_31 = arith.constant 0 : index
    %86 = vector.load %arg3[%c0_29, %c0_30, %c0_31] : memref<1x16x8xf32, #tpu.memory_space<vmem>>, vector<1x16x8xf32>
    %87 = vector.shape_cast %86 : vector<1x16x8xf32> to vector<16x8xf32>
    %88 = vector.broadcast %4 : vector<16x1xf32> to vector<16x8xf32>
    %89 = arith.mulf %87, %88 : vector<16x8xf32>
    %cst_32 = arith.constant dense<0.000000e+00> : vector<16xf32>
    %90 = vector.multi_reduction <add>, %85, %cst_32 [1] : vector<16x16xf32> to vector<16xf32>
    %91 = vector.shape_cast %90 : vector<16xf32> to vector<16x1xf32>
    %92 = arith.truncf %85 : vector<16x16xf32> to vector<16x16xbf16>
    %93 = arith.truncf %89 : vector<16x8xf32> to vector<16x8xbf16>
    %cst_33 = arith.constant dense<0.000000e+00> : vector<16x8xf32>
    %94 = tpu.matmul %92, %93, %cst_33 {dimension_numbers = #tpu.dot_dimension_numbers<[1], [0], [0], [1], [0, 0, 1, 1], [], []>} : vector<16x16xbf16>, vector<16x8xbf16>, vector<16x8xf32> -> vector<16x8xf32>
    %95 = arith.mulf %89, %94 : vector<16x8xf32>
    %cst_34 = arith.constant dense<0.000000e+00> : vector<16xf32>
    %96 = vector.multi_reduction <add>, %95, %cst_34 [1] : vector<16x8xf32> to vector<16xf32>
    %97 = vector.shape_cast %96 : vector<16xf32> to vector<16x1xf32>
    %cst_35 = arith.constant dense<0.000000e+00> : vector<1xf32>
    %98 = vector.multi_reduction <add>, %97, %cst_35 [0] : vector<16x1xf32> to vector<1xf32>
    %99 = vector.shape_cast %98 : vector<1xf32> to vector<1x1xf32>
    %100 = arith.mulf %89, %89 : vector<16x8xf32>
    %cst_36 = arith.constant dense<0.000000e+00> : vector<16xf32>
    %101 = vector.multi_reduction <add>, %100, %cst_36 [1] : vector<16x8xf32> to vector<16xf32>
    %102 = vector.shape_cast %101 : vector<16xf32> to vector<16x1xf32>
    %103 = arith.mulf %91, %102 : vector<16x1xf32>
    %cst_37 = arith.constant dense<0.000000e+00> : vector<16xf32>
    %104 = vector.multi_reduction <add>, %103, %cst_37 [1] : vector<16x1xf32> to vector<16xf32>
    %105 = vector.shape_cast %104 : vector<16xf32> to vector<16x1xf32>
    %cst_38 = arith.constant dense<0.000000e+00> : vector<1xf32>
    %106 = vector.multi_reduction <add>, %105, %cst_38 [0] : vector<16x1xf32> to vector<1xf32>
    %107 = vector.shape_cast %106 : vector<1xf32> to vector<1x1xf32>
    %108 = arith.subf %107, %99 : vector<1x1xf32>
    %109 = arith.truncf %89 : vector<16x8xf32> to vector<16x8xbf16>
    %110 = arith.truncf %89 : vector<16x8xf32> to vector<16x8xbf16>
    %cst_39 = arith.constant dense<0.000000e+00> : vector<8x8xf32>
    %111 = tpu.matmul %109, %110, %cst_39 {dimension_numbers = #tpu.dot_dimension_numbers<[0], [0], [1], [1], [0, 1, 1, 1], [], []>} : vector<16x8xbf16>, vector<16x8xbf16>, vector<8x8xf32> -> vector<8x8xf32>
    %c0_40 = arith.constant 0 : index
    %c0_41 = arith.constant 0 : index
    %c0_42 = arith.constant 0 : index
    %112 = vector.load %arg7[%c0_40, %c0_41, %c0_42] : memref<1x8x8xf32, #tpu.memory_space<vmem>>, vector<1x8x8xf32>
    %113 = vector.shape_cast %112 : vector<1x8x8xf32> to vector<8x8xf32>
    %114 = vector.shape_cast %111 : vector<8x8xf32> to vector<1x8x8xf32>
    tpu.vector_store %arg7[%c0_40, %c0_41, %c0_42], %114 {strides = array<i32>} : memref<1x8x8xf32, #tpu.memory_space<vmem>>, vector<1x8x8xf32>,
    %cst_43 = arith.constant dense<0.000000e+00> : vector<16xf32>
    %115 = vector.multi_reduction <add>, %91, %cst_43 [1] : vector<16x1xf32> to vector<16xf32>
    %116 = vector.shape_cast %115 : vector<16xf32> to vector<16x1xf32>
    %cst_44 = arith.constant dense<0.000000e+00> : vector<1xf32>
    %117 = vector.multi_reduction <add>, %116, %cst_44 [0] : vector<16x1xf32> to vector<1xf32>
    %118 = vector.shape_cast %117 : vector<1xf32> to vector<1x1xf32>
    %119 = math.sqrt %107 : vector<1x1xf32>
    %cst_45 = arith.constant 1.000000e-15 : f32
    %120 = vector.broadcast %cst_45 : f32 to vector<1x1xf32>
    %121 = arith.addf %119, %120 : vector<1x1xf32>
    %122 = vector.broadcast %121 : vector<1x1xf32> to vector<16x8xf32>
    %123 = arith.divf %89, %122 : vector<16x8xf32>
    %cst_46 = arith.constant dense<0.000000e+00> : vector<16x16xf32>
    %124 = tpu.matmul %123, %123, %cst_46 {dimension_numbers = #tpu.dot_dimension_numbers<[1], [1], [0], [0], [0, 0, 1, 0], [], []>} : vector<16x8xf32>, vector<16x8xf32>, vector<16x16xf32> -> vector<16x16xf32>
    %125 = arith.mulf %123, %123 : vector<16x8xf32>
    %cst_47 = arith.constant dense<0.000000e+00> : vector<16xf32>
    %126 = vector.multi_reduction <add>, %125, %cst_47 [1] : vector<16x8xf32> to vector<16xf32>
    %127 = vector.shape_cast %126 : vector<16xf32> to vector<16x1xf32>
    %128 = tpu.transpose %127, [1, 0] : vector<16x1xf32> -> vector<1x16xf32>
    %129 = vector.broadcast %127 : vector<16x1xf32> to vector<16x16xf32>
    %130 = vector.broadcast %128 : vector<1x16xf32> to vector<16x16xf32>
    %131 = arith.addf %129, %130 : vector<16x16xf32>
    %cst_48 = arith.constant 2.000000e+00 : f32
    %132 = vector.broadcast %cst_48 : f32 to vector<16x16xf32>
    %133 = arith.mulf %132, %124 : vector<16x16xf32>
    %134 = arith.subf %131, %133 : vector<16x16xf32>
    %cst_49 = arith.constant 0.000000e+00 : f32
    %135 = vector.broadcast %cst_49 : f32 to vector<16x16xf32>
    %136 = arith.maximumf %134, %135 : vector<16x16xf32>
    %137 = math.sqrt %136 : vector<16x16xf32>
    %138 = vector.broadcast %118 : vector<1x1xf32> to vector<16x16xf32>
    %139 = arith.mulf %137, %138 : vector<16x16xf32>
    %140 = arith.mulf %139, %85 : vector<16x16xf32>
    %141 = arith.truncf %140 : vector<16x16xf32> to vector<16x16xbf16>
    %c0_50 = arith.constant 0 : index
    %c0_51 = arith.constant 0 : index
    %c0_52 = arith.constant 0 : index
    %142 = vector.load %arg5[%c0_50, %c0_51, %c0_52] : memref<1x16x16xbf16, #tpu.memory_space<vmem>>, vector<1x16x16xbf16>
    %143 = vector.shape_cast %142 : vector<1x16x16xbf16> to vector<16x16xbf16>
    %144 = vector.shape_cast %141 : vector<16x16xbf16> to vector<1x16x16xbf16>
    tpu.vector_store %arg5[%c0_50, %c0_51, %c0_52], %144 {strides = array<i32>} : memref<1x16x16xbf16, #tpu.memory_space<vmem>>, vector<1x16x16xbf16>,
    %145 = tpu.iota {dimensions = array<i32: 1>} : vector<1x4xi32>
    %cst_53 = arith.constant 0.000000e+00 : f32
    %146 = vector.broadcast %cst_53 : f32 to vector<1x4xf32>
    %c0_i32 = arith.constant 0 : i32
    %147 = vector.broadcast %c0_i32 : i32 to vector<1x4xi32>
    %148 = arith.cmpi eq, %145, %147 : vector<1x4xi32>
    %149 = vector.shape_cast %25 : vector<1x1xf32> to vector<1x1xf32>
    %150 = vector.broadcast %149 : vector<1x1xf32> to vector<1x4xf32>
    %151 = arith.select %148, %150, %146 : vector<1x4xi1>, vector<1x4xf32>
    %c1_i32 = arith.constant 1 : i32
    %152 = vector.broadcast %c1_i32 : i32 to vector<1x4xi32>
    %153 = arith.cmpi eq, %145, %152 : vector<1x4xi32>
    %154 = vector.shape_cast %35 : vector<1x1xf32> to vector<1x1xf32>
    %155 = vector.broadcast %154 : vector<1x1xf32> to vector<1x4xf32>
    %156 = arith.select %153, %155, %151 : vector<1x4xi1>, vector<1x4xf32>
    %c2_i32 = arith.constant 2 : i32
    %157 = vector.broadcast %c2_i32 : i32 to vector<1x4xi32>
    %158 = arith.cmpi eq, %145, %157 : vector<1x4xi32>
    %159 = vector.shape_cast %108 : vector<1x1xf32> to vector<1x1xf32>
    %160 = vector.broadcast %159 : vector<1x1xf32> to vector<1x4xf32>
    %161 = arith.select %158, %160, %156 : vector<1x4xi1>, vector<1x4xf32>
    %c3_i32 = arith.constant 3 : i32
    %162 = vector.broadcast %c3_i32 : i32 to vector<1x4xi32>
    %163 = arith.cmpi eq, %145, %162 : vector<1x4xi32>
    %164 = vector.shape_cast %107 : vector<1x1xf32> to vector<1x1xf32>
    %165 = vector.broadcast %164 : vector<1x1xf32> to vector<1x4xf32>
    %166 = arith.select %163, %165, %161 : vector<1x4xi1>, vector<1x4xf32>
    %c0_54 = arith.constant 0 : index
    %c0_55 = arith.constant 0 : index
    %c0_56 = arith.constant 0 : index
    %167 = vector.load %arg8[%c0_54, %c0_55, %c0_56] : memref<1x1x4xf32, #tpu.memory_space<vmem>>, vector<1x1x4xf32>
    %168 = vector.shape_cast %167 : vector<1x1x4xf32> to vector<1x4xf32>
    %169 = vector.shape_cast %166 : vector<1x4xf32> to vector<1x1x4xf32>
    tpu.vector_store %arg8[%c0_54, %c0_55, %c0_56], %169 {strides = array<i32>} : memref<1x1x4xf32, #tpu.memory_space<vmem>>, vector<1x1x4xf32>,
    return
  }
  func.func @transform_0(%arg0: i32) -> (i32, i32, i32) {
    %c0_i32 = arith.constant 0 : i32
    %c0_i32_0 = arith.constant 0 : i32
    %c0_i32_1 = arith.constant 0 : i32
    return %arg0, %c0_i32, %c0_i32_0 : i32, i32, i32
  }
  func.func @transform_1(%arg0: i32) -> (i32, i32, i32) {
    %c0_i32 = arith.constant 0 : i32
    %c0_i32_0 = arith.constant 0 : i32
    %c0_i32_1 = arith.constant 0 : i32
    return %arg0, %c0_i32, %c0_i32_0 : i32, i32, i32
  }
  func.func @transform_2(%arg0: i32) -> (i32, i32, i32) {
    %c0_i32 = arith.constant 0 : i32
    %c0_i32_0 = arith.constant 0 : i32
    %c0_i32_1 = arith.constant 0 : i32
    return %arg0, %c0_i32, %c0_i32_0 : i32, i32, i32
  }
  func.func @transform_3(%arg0: i32) -> (i32, i32, i32) {
    %c0_i32 = arith.constant 0 : i32
    %c0_i32_0 = arith.constant 0 : i32
    %c0_i32_1 = arith.constant 0 : i32
    return %arg0, %c0_i32, %c0_i32_0 : i32, i32, i32
  }
  func.func @transform_4(%arg0: i32) -> (i32, i32, i32) {
    %c0_i32 = arith.constant 0 : i32
    %c0_i32_0 = arith.constant 0 : i32
    %c0_i32_1 = arith.constant 0 : i32
    return %arg0, %c0_i32, %c0_i32_0 : i32, i32, i32
  }
  func.func @transform_5(%arg0: i32) -> (i32, i32, i32) {
    %c0_i32 = arith.constant 0 : i32
    %c0_i32_0 = arith.constant 0 : i32
    %c0_i32_1 = arith.constant 0 : i32
    return %arg0, %c0_i32, %c0_i32_0 : i32, i32, i32
  }
  func.func @transform_6(%arg0: i32) -> (i32, i32, i32) {
    %c0_i32 = arith.constant 0 : i32
    %c0_i32_0 = arith.constant 0 : i32
    %c0_i32_1 = arith.constant 0 : i32
    return %arg0, %c0_i32, %c0_i32_0 : i32, i32, i32
  }
  func.func @transform_7(%arg0: i32) -> (i32, i32, i32) {
    %c0_i32 = arith.constant 0 : i32
    %c0_i32_0 = arith.constant 0 : i32
    %c0_i32_1 = arith.constant 0 : i32
    return %arg0, %c0_i32, %c0_i32_0 : i32, i32, i32
  }
}

module attributes {stable_mosaic.version = 11 : i64} {
  func.func @_conv1_poolmc_kernel(%arg0: i32, %arg1: memref<1x16x16xbf16, #tpu.memory_space<vmem>>, %arg2: memref<1x16x32xf32, #tpu.memory_space<vmem>>, %arg3: memref<32x32xf32, #tpu.memory_space<vmem>>, %arg4: memref<1x32xf32, #tpu.memory_space<vmem>>, %arg5: memref<32x32xf32, #tpu.memory_space<vmem>>, %arg6: memref<16x32xf32, #tpu.memory_space<vmem>>, %arg7: memref<1x16xf32, #tpu.memory_space<vmem>>, %arg8: memref<1x16x32xf32, #tpu.memory_space<vmem>>, %arg9: memref<1x16x16xf32, #tpu.memory_space<vmem>>) attributes {dimension_semantics = [#tpu.dimension_semantics<parallel>], iteration_bounds = array<i64: 2>, scalar_prefetch = 0 : i64, scratch_operands = 0 : i64, tpu.core_type = #tpu.core_type<tc>, window_params = [{transform_indices = @transform_0, window_bounds = array<i64: 1, 16, 16>}, {transform_indices = @transform_1, window_bounds = array<i64: 1, 16, 32>}, {pipeline_mode = #tpu.pipeline_mode<synchronous>, transform_indices = @transform_2, window_bounds = array<i64: 32, 32>}, {pipeline_mode = #tpu.pipeline_mode<synchronous>, transform_indices = @transform_3, window_bounds = array<i64: 1, 32>}, {pipeline_mode = #tpu.pipeline_mode<synchronous>, transform_indices = @transform_4, window_bounds = array<i64: 32, 32>}, {pipeline_mode = #tpu.pipeline_mode<synchronous>, transform_indices = @transform_5, window_bounds = array<i64: 16, 32>}, {pipeline_mode = #tpu.pipeline_mode<synchronous>, transform_indices = @transform_6, window_bounds = array<i64: 1, 16>}, {transform_indices = @transform_7, window_bounds = array<i64: 1, 16, 32>}, {transform_indices = @transform_8, window_bounds = array<i64: 1, 16, 16>}]} {
    %c0 = arith.constant 0 : index
    %c0_0 = arith.constant 0 : index
    %c0_1 = arith.constant 0 : index
    %0 = vector.load %arg1[%c0, %c0_0, %c0_1] : memref<1x16x16xbf16, #tpu.memory_space<vmem>>, vector<1x16x16xbf16>
    %1 = vector.shape_cast %0 : vector<1x16x16xbf16> to vector<16x16xbf16>
    %c0_2 = arith.constant 0 : index
    %c0_3 = arith.constant 0 : index
    %c0_4 = arith.constant 0 : index
    %2 = vector.load %arg2[%c0_2, %c0_3, %c0_4] : memref<1x16x32xf32, #tpu.memory_space<vmem>>, vector<1x16x32xf32>
    %3 = vector.shape_cast %2 : vector<1x16x32xf32> to vector<16x32xf32>
    %4 = arith.truncf %3 : vector<16x32xf32> to vector<16x32xbf16>
    %cst = arith.constant dense<0.000000e+00> : vector<16x32xf32>
    %5 = tpu.matmul %1, %4, %cst {dimension_numbers = #tpu.dot_dimension_numbers<[1], [0], [0], [1], [0, 0, 1, 1], [], []>} : vector<16x16xbf16>, vector<16x32xbf16>, vector<16x32xf32> -> vector<16x32xf32>
    %c0_5 = arith.constant 0 : index
    %c0_6 = arith.constant 0 : index
    %6 = vector.load %arg3[%c0_5, %c0_6] : memref<32x32xf32, #tpu.memory_space<vmem>>, vector<32x32xf32>
    %7 = arith.truncf %5 : vector<16x32xf32> to vector<16x32xbf16>
    %8 = arith.truncf %6 : vector<32x32xf32> to vector<32x32xbf16>
    %cst_7 = arith.constant dense<0.000000e+00> : vector<16x32xf32>
    %9 = tpu.matmul %7, %8, %cst_7 {dimension_numbers = #tpu.dot_dimension_numbers<[1], [1], [0], [0], [0, 0, 1, 0], [], []>} : vector<16x32xbf16>, vector<32x32xbf16>, vector<16x32xf32> -> vector<16x32xf32>
    %c0_8 = arith.constant 0 : index
    %c0_9 = arith.constant 0 : index
    %10 = vector.load %arg4[%c0_8, %c0_9] : memref<1x32xf32, #tpu.memory_space<vmem>>, vector<1x32xf32>
    %11 = vector.broadcast %10 : vector<1x32xf32> to vector<16x32xf32>
    %12 = arith.addf %9, %11 : vector<16x32xf32>
    %c0_10 = arith.constant 0 : index
    %c0_11 = arith.constant 0 : index
    %13 = vector.load %arg5[%c0_10, %c0_11] : memref<32x32xf32, #tpu.memory_space<vmem>>, vector<32x32xf32>
    %14 = arith.truncf %3 : vector<16x32xf32> to vector<16x32xbf16>
    %15 = arith.truncf %13 : vector<32x32xf32> to vector<32x32xbf16>
    %cst_12 = arith.constant dense<0.000000e+00> : vector<16x32xf32>
    %16 = tpu.matmul %14, %15, %cst_12 {dimension_numbers = #tpu.dot_dimension_numbers<[1], [1], [0], [0], [0, 0, 1, 0], [], []>} : vector<16x32xbf16>, vector<32x32xbf16>, vector<16x32xf32> -> vector<16x32xf32>
    %17 = arith.addf %12, %16 : vector<16x32xf32>
    %c0_13 = arith.constant 0 : index
    %c0_14 = arith.constant 0 : index
    %c0_15 = arith.constant 0 : index
    %18 = vector.load %arg8[%c0_13, %c0_14, %c0_15] : memref<1x16x32xf32, #tpu.memory_space<vmem>>, vector<1x16x32xf32>
    %19 = vector.shape_cast %18 : vector<1x16x32xf32> to vector<16x32xf32>
    %20 = vector.shape_cast %17 : vector<16x32xf32> to vector<1x16x32xf32>
    tpu.vector_store %arg8[%c0_13, %c0_14, %c0_15], %20 {strides = array<i32>} : memref<1x16x32xf32, #tpu.memory_space<vmem>>, vector<1x16x32xf32>,
    %c0_16 = arith.constant 0 : index
    %c0_17 = arith.constant 0 : index
    %21 = vector.load %arg6[%c0_16, %c0_17] : memref<16x32xf32, #tpu.memory_space<vmem>>, vector<16x32xf32>
    %22 = arith.truncf %17 : vector<16x32xf32> to vector<16x32xbf16>
    %23 = arith.truncf %21 : vector<16x32xf32> to vector<16x32xbf16>
    %cst_18 = arith.constant dense<0.000000e+00> : vector<16x16xf32>
    %24 = tpu.matmul %22, %23, %cst_18 {dimension_numbers = #tpu.dot_dimension_numbers<[1], [1], [0], [0], [0, 0, 1, 0], [], []>} : vector<16x32xbf16>, vector<16x32xbf16>, vector<16x16xf32> -> vector<16x16xf32>
    %c0_19 = arith.constant 0 : index
    %c0_20 = arith.constant 0 : index
    %25 = vector.load %arg7[%c0_19, %c0_20] : memref<1x16xf32, #tpu.memory_space<vmem>>, vector<1x16xf32>
    %26 = vector.broadcast %25 : vector<1x16xf32> to vector<16x16xf32>
    %27 = arith.addf %24, %26 : vector<16x16xf32>
    %c0_21 = arith.constant 0 : index
    %c0_22 = arith.constant 0 : index
    %c0_23 = arith.constant 0 : index
    %28 = vector.load %arg9[%c0_21, %c0_22, %c0_23] : memref<1x16x16xf32, #tpu.memory_space<vmem>>, vector<1x16x16xf32>
    %29 = vector.shape_cast %28 : vector<1x16x16xf32> to vector<16x16xf32>
    %30 = vector.shape_cast %27 : vector<16x16xf32> to vector<1x16x16xf32>
    tpu.vector_store %arg9[%c0_21, %c0_22, %c0_23], %30 {strides = array<i32>} : memref<1x16x16xf32, #tpu.memory_space<vmem>>, vector<1x16x16xf32>,
    return
  }
  func.func @transform_0(%arg0: i32) -> (i32, i32, i32) {
    %c0_i32 = arith.constant 0 : i32
    %c0_i32_0 = arith.constant 0 : i32
    %c0_i32_1 = arith.constant 0 : i32
    return %arg0, %c0_i32, %c0_i32_0 : i32, i32, i32
  }
  func.func @transform_1(%arg0: i32) -> (i32, i32, i32) {
    %c0_i32 = arith.constant 0 : i32
    %c0_i32_0 = arith.constant 0 : i32
    %c0_i32_1 = arith.constant 0 : i32
    return %arg0, %c0_i32, %c0_i32_0 : i32, i32, i32
  }
  func.func @transform_2(%arg0: i32) -> (i32, i32) {
    %c0_i32 = arith.constant 0 : i32
    %c0_i32_0 = arith.constant 0 : i32
    %c0_i32_1 = arith.constant 0 : i32
    return %c0_i32, %c0_i32_0 : i32, i32
  }
  func.func @transform_3(%arg0: i32) -> (i32, i32) {
    %c0_i32 = arith.constant 0 : i32
    %c0_i32_0 = arith.constant 0 : i32
    %c0_i32_1 = arith.constant 0 : i32
    return %c0_i32, %c0_i32_0 : i32, i32
  }
  func.func @transform_4(%arg0: i32) -> (i32, i32) {
    %c0_i32 = arith.constant 0 : i32
    %c0_i32_0 = arith.constant 0 : i32
    %c0_i32_1 = arith.constant 0 : i32
    return %c0_i32, %c0_i32_0 : i32, i32
  }
  func.func @transform_5(%arg0: i32) -> (i32, i32) {
    %c0_i32 = arith.constant 0 : i32
    %c0_i32_0 = arith.constant 0 : i32
    %c0_i32_1 = arith.constant 0 : i32
    return %c0_i32, %c0_i32_0 : i32, i32
  }
  func.func @transform_6(%arg0: i32) -> (i32, i32) {
    %c0_i32 = arith.constant 0 : i32
    %c0_i32_0 = arith.constant 0 : i32
    %c0_i32_1 = arith.constant 0 : i32
    return %c0_i32, %c0_i32_0 : i32, i32
  }
  func.func @transform_7(%arg0: i32) -> (i32, i32, i32) {
    %c0_i32 = arith.constant 0 : i32
    %c0_i32_0 = arith.constant 0 : i32
    %c0_i32_1 = arith.constant 0 : i32
    return %arg0, %c0_i32, %c0_i32_0 : i32, i32, i32
  }
  func.func @transform_8(%arg0: i32) -> (i32, i32, i32) {
    %c0_i32 = arith.constant 0 : i32
    %c0_i32_0 = arith.constant 0 : i32
    %c0_i32_1 = arith.constant 0 : i32
    return %arg0, %c0_i32, %c0_i32_0 : i32, i32, i32
  }
}

module attributes {stable_mosaic.version = 11 : i64} {
  func.func @_pool_conv2_kernel(%arg0: i32, %arg1: memref<1x16x16xbf16, #tpu.memory_space<vmem>>, %arg2: memref<1x16x32xf32, #tpu.memory_space<vmem>>, %arg3: memref<1x16x16xf32, #tpu.memory_space<vmem>>, %arg4: memref<1x16x1xf32, #tpu.memory_space<vmem>>, %arg5: memref<32x32xf32, #tpu.memory_space<vmem>>, %arg6: memref<1x32xf32, #tpu.memory_space<vmem>>, %arg7: memref<32x32xf32, #tpu.memory_space<vmem>>, %arg8: memref<1x1x32xf32, #tpu.memory_space<vmem>>, %arg9: memref<1x16x16xf32, #tpu.memory_space<vmem>>, %arg10: memref<1x1x2xf32, #tpu.memory_space<vmem>>) attributes {dimension_semantics = [#tpu.dimension_semantics<parallel>], iteration_bounds = array<i64: 2>, scalar_prefetch = 0 : i64, scratch_operands = 0 : i64, tpu.core_type = #tpu.core_type<tc>, window_params = [{transform_indices = @transform_0, window_bounds = array<i64: 1, 16, 16>}, {transform_indices = @transform_1, window_bounds = array<i64: 1, 16, 32>}, {transform_indices = @transform_2, window_bounds = array<i64: 1, 16, 16>}, {transform_indices = @transform_3, window_bounds = array<i64: 1, 16, 1>}, {pipeline_mode = #tpu.pipeline_mode<synchronous>, transform_indices = @transform_4, window_bounds = array<i64: 32, 32>}, {pipeline_mode = #tpu.pipeline_mode<synchronous>, transform_indices = @transform_5, window_bounds = array<i64: 1, 32>}, {pipeline_mode = #tpu.pipeline_mode<synchronous>, transform_indices = @transform_6, window_bounds = array<i64: 32, 32>}, {transform_indices = @transform_7, window_bounds = array<i64: 1, 1, 32>}, {transform_indices = @transform_8, window_bounds = array<i64: 1, 16, 16>}, {transform_indices = @transform_9, window_bounds = array<i64: 1, 1, 2>}]} {
    %c0 = arith.constant 0 : index
    %c0_0 = arith.constant 0 : index
    %c0_1 = arith.constant 0 : index
    %0 = vector.load %arg1[%c0, %c0_0, %c0_1] : memref<1x16x16xbf16, #tpu.memory_space<vmem>>, vector<1x16x16xbf16>
    %1 = vector.shape_cast %0 : vector<1x16x16xbf16> to vector<16x16xbf16>
    %c0_2 = arith.constant 0 : index
    %c0_3 = arith.constant 0 : index
    %c0_4 = arith.constant 0 : index
    %2 = vector.load %arg4[%c0_2, %c0_3, %c0_4] : memref<1x16x1xf32, #tpu.memory_space<vmem>>, vector<1x16x1xf32>
    %3 = vector.shape_cast %2 : vector<1x16x1xf32> to vector<16x1xf32>
    %c0_5 = arith.constant 0 : index
    %c0_6 = arith.constant 0 : index
    %c0_7 = arith.constant 0 : index
    %4 = vector.load %arg2[%c0_5, %c0_6, %c0_7] : memref<1x16x32xf32, #tpu.memory_space<vmem>>, vector<1x16x32xf32>
    %5 = vector.shape_cast %4 : vector<1x16x32xf32> to vector<16x32xf32>
    %6 = vector.broadcast %3 : vector<16x1xf32> to vector<16x32xf32>
    %7 = arith.mulf %5, %6 : vector<16x32xf32>
    %c0_8 = arith.constant 0 : index
    %c0_9 = arith.constant 0 : index
    %c0_10 = arith.constant 0 : index
    %8 = vector.load %arg3[%c0_8, %c0_9, %c0_10] : memref<1x16x16xf32, #tpu.memory_space<vmem>>, vector<1x16x16xf32>
    %9 = vector.shape_cast %8 : vector<1x16x16xf32> to vector<16x16xf32>
    %cst = arith.constant dense<0xFF800000> : vector<16xf32>
    %10 = vector.multi_reduction <maximumf>, %9, %cst [1] : vector<16x16xf32> to vector<16xf32>
    %11 = vector.shape_cast %10 : vector<16xf32> to vector<16x1xf32>
    %12 = vector.broadcast %11 : vector<16x1xf32> to vector<16x16xf32>
    %13 = arith.subf %9, %12 : vector<16x16xf32>
    %14 = math.exp %13 : vector<16x16xf32>
    %cst_11 = arith.constant dense<0.000000e+00> : vector<16xf32>
    %15 = vector.multi_reduction <add>, %14, %cst_11 [1] : vector<16x16xf32> to vector<16xf32>
    %16 = vector.shape_cast %15 : vector<16xf32> to vector<16x1xf32>
    %17 = vector.broadcast %16 : vector<16x1xf32> to vector<16x16xf32>
    %18 = arith.divf %14, %17 : vector<16x16xf32>
    %19 = vector.broadcast %3 : vector<16x1xf32> to vector<16x16xf32>
    %20 = arith.mulf %18, %19 : vector<16x16xf32>
    %21 = arith.truncf %20 : vector<16x16xf32> to vector<16x16xbf16>
    %22 = arith.truncf %7 : vector<16x32xf32> to vector<16x32xbf16>
    %cst_12 = arith.constant dense<0.000000e+00> : vector<16x32xf32>
    %23 = tpu.matmul %21, %22, %cst_12 {dimension_numbers = #tpu.dot_dimension_numbers<[0], [0], [1], [1], [0, 1, 1, 1], [], []>} : vector<16x16xbf16>, vector<16x32xbf16>, vector<16x32xf32> -> vector<16x32xf32>
    %24 = arith.truncf %20 : vector<16x16xf32> to vector<16x16xbf16>
    %cst_13 = arith.constant dense<0.000000e+00> : vector<16x16xf32>
    %25 = tpu.matmul %1, %24, %cst_13 {dimension_numbers = #tpu.dot_dimension_numbers<[1], [0], [0], [1], [0, 0, 1, 1], [], []>} : vector<16x16xbf16>, vector<16x16xbf16>, vector<16x16xf32> -> vector<16x16xf32>
    %26 = arith.truncf %20 : vector<16x16xf32> to vector<16x16xbf16>
    %27 = arith.truncf %25 : vector<16x16xf32> to vector<16x16xbf16>
    %cst_14 = arith.constant dense<0.000000e+00> : vector<16x16xf32>
    %28 = tpu.matmul %26, %27, %cst_14 {dimension_numbers = #tpu.dot_dimension_numbers<[0], [0], [1], [1], [0, 1, 1, 1], [], []>} : vector<16x16xbf16>, vector<16x16xbf16>, vector<16x16xf32> -> vector<16x16xf32>
    %29 = arith.mulf %20, %25 : vector<16x16xf32>
    %cst_15 = arith.constant dense<0.000000e+00> : vector<16xf32>
    %30 = vector.multi_reduction <add>, %29, %cst_15 [1] : vector<16x16xf32> to vector<16xf32>
    %31 = vector.shape_cast %30 : vector<16xf32> to vector<16x1xf32>
    %cst_16 = arith.constant dense<0.000000e+00> : vector<1xf32>
    %32 = vector.multi_reduction <add>, %31, %cst_16 [0] : vector<16x1xf32> to vector<1xf32>
    %33 = vector.shape_cast %32 : vector<1xf32> to vector<1x1xf32>
    %34 = arith.extf %1 : vector<16x16xbf16> to vector<16x16xf32>
    %cst_17 = arith.constant dense<0.000000e+00> : vector<16xf32>
    %35 = vector.multi_reduction <add>, %34, %cst_17 [1] : vector<16x16xf32> to vector<16xf32>
    %36 = vector.shape_cast %35 : vector<16xf32> to vector<16x1xf32>
    %37 = arith.mulf %20, %20 : vector<16x16xf32>
    %cst_18 = arith.constant dense<0.000000e+00> : vector<16xf32>
    %38 = vector.multi_reduction <add>, %37, %cst_18 [1] : vector<16x16xf32> to vector<16xf32>
    %39 = vector.shape_cast %38 : vector<16xf32> to vector<16x1xf32>
    %40 = arith.mulf %36, %39 : vector<16x1xf32>
    %cst_19 = arith.constant dense<0.000000e+00> : vector<16xf32>
    %41 = vector.multi_reduction <add>, %40, %cst_19 [1] : vector<16x1xf32> to vector<16xf32>
    %42 = vector.shape_cast %41 : vector<16xf32> to vector<16x1xf32>
    %cst_20 = arith.constant dense<0.000000e+00> : vector<1xf32>
    %43 = vector.multi_reduction <add>, %42, %cst_20 [0] : vector<16x1xf32> to vector<1xf32>
    %44 = vector.shape_cast %43 : vector<1xf32> to vector<1x1xf32>
    %45 = arith.truncf %20 : vector<16x16xf32> to vector<16x16xbf16>
    %46 = arith.truncf %20 : vector<16x16xf32> to vector<16x16xbf16>
    %cst_21 = arith.constant dense<0.000000e+00> : vector<16x16xf32>
    %47 = tpu.matmul %45, %46, %cst_21 {dimension_numbers = #tpu.dot_dimension_numbers<[0], [0], [1], [1], [0, 1, 1, 1], [], []>} : vector<16x16xbf16>, vector<16x16xbf16>, vector<16x16xf32> -> vector<16x16xf32>
    %c0_22 = arith.constant 0 : index
    %c0_23 = arith.constant 0 : index
    %c0_24 = arith.constant 0 : index
    %48 = vector.load %arg9[%c0_22, %c0_23, %c0_24] : memref<1x16x16xf32, #tpu.memory_space<vmem>>, vector<1x16x16xf32>
    %49 = vector.shape_cast %48 : vector<1x16x16xf32> to vector<16x16xf32>
    %50 = vector.shape_cast %47 : vector<16x16xf32> to vector<1x16x16xf32>
    tpu.vector_store %arg9[%c0_22, %c0_23, %c0_24], %50 {strides = array<i32>} : memref<1x16x16xf32, #tpu.memory_space<vmem>>, vector<1x16x16xf32>,
    %51 = tpu.iota {dimensions = array<i32: 1>} : vector<1x2xi32>
    %cst_25 = arith.constant 0.000000e+00 : f32
    %52 = vector.broadcast %cst_25 : f32 to vector<1x2xf32>
    %c0_i32 = arith.constant 0 : i32
    %53 = vector.broadcast %c0_i32 : i32 to vector<1x2xi32>
    %54 = arith.cmpi eq, %51, %53 : vector<1x2xi32>
    %55 = vector.shape_cast %33 : vector<1x1xf32> to vector<1x1xf32>
    %56 = vector.broadcast %55 : vector<1x1xf32> to vector<1x2xf32>
    %57 = arith.select %54, %56, %52 : vector<1x2xi1>, vector<1x2xf32>
    %c1_i32 = arith.constant 1 : i32
    %58 = vector.broadcast %c1_i32 : i32 to vector<1x2xi32>
    %59 = arith.cmpi eq, %51, %58 : vector<1x2xi32>
    %60 = vector.shape_cast %44 : vector<1x1xf32> to vector<1x1xf32>
    %61 = vector.broadcast %60 : vector<1x1xf32> to vector<1x2xf32>
    %62 = arith.select %59, %61, %57 : vector<1x2xi1>, vector<1x2xf32>
    %c0_26 = arith.constant 0 : index
    %c0_27 = arith.constant 0 : index
    %c0_28 = arith.constant 0 : index
    %63 = vector.load %arg10[%c0_26, %c0_27, %c0_28] : memref<1x1x2xf32, #tpu.memory_space<vmem>>, vector<1x1x2xf32>
    %64 = vector.shape_cast %63 : vector<1x1x2xf32> to vector<1x2xf32>
    %65 = vector.shape_cast %62 : vector<1x2xf32> to vector<1x1x2xf32>
    tpu.vector_store %arg10[%c0_26, %c0_27, %c0_28], %65 {strides = array<i32>} : memref<1x1x2xf32, #tpu.memory_space<vmem>>, vector<1x1x2xf32>,
    %66 = tpu.iota {dimensions = array<i32: 0>} : vector<16x16xi32>
    %67 = tpu.iota {dimensions = array<i32: 1>} : vector<16x16xi32>
    %68 = arith.cmpi eq, %66, %67 : vector<16x16xi32>
    %cst_29 = arith.constant 0.000000e+00 : f32
    %69 = vector.broadcast %cst_29 : f32 to vector<16x16xf32>
    %70 = arith.select %68, %69, %28 : vector<16x16xi1>, vector<16x16xf32>
    %cst_30 = arith.constant dense<0.000000e+00> : vector<16xf32>
    %71 = vector.multi_reduction <add>, %70, %cst_30 [1] : vector<16x16xf32> to vector<16xf32>
    %72 = vector.shape_cast %71 : vector<16xf32> to vector<16x1xf32>
    %73 = math.sqrt %72 : vector<16x1xf32>
    %cst_31 = arith.constant 1.000000e-15 : f32
    %74 = vector.broadcast %cst_31 : f32 to vector<16x1xf32>
    %75 = arith.addf %73, %74 : vector<16x1xf32>
    %76 = tpu.transpose %75, [1, 0] : vector<16x1xf32> -> vector<1x16xf32>
    %77 = vector.broadcast %76 : vector<1x16xf32> to vector<16x16xf32>
    %78 = arith.divf %70, %77 : vector<16x16xf32>
    %79 = vector.broadcast %75 : vector<16x1xf32> to vector<16x16xf32>
    %80 = arith.divf %78, %79 : vector<16x16xf32>
    %81 = arith.truncf %80 : vector<16x16xf32> to vector<16x16xbf16>
    %82 = arith.truncf %23 : vector<16x32xf32> to vector<16x32xbf16>
    %cst_32 = arith.constant dense<0.000000e+00> : vector<16x32xf32>
    %83 = tpu.matmul %81, %82, %cst_32 {dimension_numbers = #tpu.dot_dimension_numbers<[1], [0], [0], [1], [0, 0, 1, 1], [], []>} : vector<16x16xbf16>, vector<16x32xbf16>, vector<16x32xf32> -> vector<16x32xf32>
    %c0_33 = arith.constant 0 : index
    %c0_34 = arith.constant 0 : index
    %84 = vector.load %arg5[%c0_33, %c0_34] : memref<32x32xf32, #tpu.memory_space<vmem>>, vector<32x32xf32>
    %85 = arith.truncf %83 : vector<16x32xf32> to vector<16x32xbf16>
    %86 = arith.truncf %84 : vector<32x32xf32> to vector<32x32xbf16>
    %cst_35 = arith.constant dense<0.000000e+00> : vector<16x32xf32>
    %87 = tpu.matmul %85, %86, %cst_35 {dimension_numbers = #tpu.dot_dimension_numbers<[1], [1], [0], [0], [0, 0, 1, 0], [], []>} : vector<16x32xbf16>, vector<32x32xbf16>, vector<16x32xf32> -> vector<16x32xf32>
    %c0_36 = arith.constant 0 : index
    %c0_37 = arith.constant 0 : index
    %88 = vector.load %arg6[%c0_36, %c0_37] : memref<1x32xf32, #tpu.memory_space<vmem>>, vector<1x32xf32>
    %89 = vector.broadcast %88 : vector<1x32xf32> to vector<16x32xf32>
    %90 = arith.addf %87, %89 : vector<16x32xf32>
    %c0_38 = arith.constant 0 : index
    %c0_39 = arith.constant 0 : index
    %91 = vector.load %arg7[%c0_38, %c0_39] : memref<32x32xf32, #tpu.memory_space<vmem>>, vector<32x32xf32>
    %92 = arith.truncf %23 : vector<16x32xf32> to vector<16x32xbf16>
    %93 = arith.truncf %91 : vector<32x32xf32> to vector<32x32xbf16>
    %cst_40 = arith.constant dense<0.000000e+00> : vector<16x32xf32>
    %94 = tpu.matmul %92, %93, %cst_40 {dimension_numbers = #tpu.dot_dimension_numbers<[1], [1], [0], [0], [0, 0, 1, 0], [], []>} : vector<16x32xbf16>, vector<32x32xbf16>, vector<16x32xf32> -> vector<16x32xf32>
    %95 = arith.addf %90, %94 : vector<16x32xf32>
    %cst_41 = arith.constant dense<0.000000e+00> : vector<32xf32>
    %96 = vector.multi_reduction <add>, %95, %cst_41 [0] : vector<16x32xf32> to vector<32xf32>
    %97 = vector.shape_cast %96 : vector<32xf32> to vector<1x32xf32>
    %c0_42 = arith.constant 0 : index
    %c0_43 = arith.constant 0 : index
    %c0_44 = arith.constant 0 : index
    %98 = vector.load %arg8[%c0_42, %c0_43, %c0_44] : memref<1x1x32xf32, #tpu.memory_space<vmem>>, vector<1x1x32xf32>
    %99 = vector.shape_cast %98 : vector<1x1x32xf32> to vector<1x32xf32>
    %100 = vector.shape_cast %97 : vector<1x32xf32> to vector<1x1x32xf32>
    tpu.vector_store %arg8[%c0_42, %c0_43, %c0_44], %100 {strides = array<i32>} : memref<1x1x32xf32, #tpu.memory_space<vmem>>, vector<1x1x32xf32>,
    return
  }
  func.func @transform_0(%arg0: i32) -> (i32, i32, i32) {
    %c0_i32 = arith.constant 0 : i32
    %c0_i32_0 = arith.constant 0 : i32
    %c0_i32_1 = arith.constant 0 : i32
    return %arg0, %c0_i32, %c0_i32_0 : i32, i32, i32
  }
  func.func @transform_1(%arg0: i32) -> (i32, i32, i32) {
    %c0_i32 = arith.constant 0 : i32
    %c0_i32_0 = arith.constant 0 : i32
    %c0_i32_1 = arith.constant 0 : i32
    return %arg0, %c0_i32, %c0_i32_0 : i32, i32, i32
  }
  func.func @transform_2(%arg0: i32) -> (i32, i32, i32) {
    %c0_i32 = arith.constant 0 : i32
    %c0_i32_0 = arith.constant 0 : i32
    %c0_i32_1 = arith.constant 0 : i32
    return %arg0, %c0_i32, %c0_i32_0 : i32, i32, i32
  }
  func.func @transform_3(%arg0: i32) -> (i32, i32, i32) {
    %c0_i32 = arith.constant 0 : i32
    %c0_i32_0 = arith.constant 0 : i32
    %c0_i32_1 = arith.constant 0 : i32
    return %arg0, %c0_i32, %c0_i32_0 : i32, i32, i32
  }
  func.func @transform_4(%arg0: i32) -> (i32, i32) {
    %c0_i32 = arith.constant 0 : i32
    %c0_i32_0 = arith.constant 0 : i32
    %c0_i32_1 = arith.constant 0 : i32
    return %c0_i32, %c0_i32_0 : i32, i32
  }
  func.func @transform_5(%arg0: i32) -> (i32, i32) {
    %c0_i32 = arith.constant 0 : i32
    %c0_i32_0 = arith.constant 0 : i32
    %c0_i32_1 = arith.constant 0 : i32
    return %c0_i32, %c0_i32_0 : i32, i32
  }
  func.func @transform_6(%arg0: i32) -> (i32, i32) {
    %c0_i32 = arith.constant 0 : i32
    %c0_i32_0 = arith.constant 0 : i32
    %c0_i32_1 = arith.constant 0 : i32
    return %c0_i32, %c0_i32_0 : i32, i32
  }
  func.func @transform_7(%arg0: i32) -> (i32, i32, i32) {
    %c0_i32 = arith.constant 0 : i32
    %c0_i32_0 = arith.constant 0 : i32
    %c0_i32_1 = arith.constant 0 : i32
    return %arg0, %c0_i32, %c0_i32_0 : i32, i32, i32
  }
  func.func @transform_8(%arg0: i32) -> (i32, i32, i32) {
    %c0_i32 = arith.constant 0 : i32
    %c0_i32_0 = arith.constant 0 : i32
    %c0_i32_1 = arith.constant 0 : i32
    return %arg0, %c0_i32, %c0_i32_0 : i32, i32, i32
  }
  func.func @transform_9(%arg0: i32) -> (i32, i32, i32) {
    %c0_i32 = arith.constant 0 : i32
    %c0_i32_0 = arith.constant 0 : i32
    %c0_i32_1 = arith.constant 0 : i32
    return %arg0, %c0_i32, %c0_i32_0 : i32, i32, i32
  }
}

</mosaic_0001>

<bundles_post_ra>
// kernel: diffwire_forward.6
= control target key start
LH: loop header
LB: loop body
LE: loop exit
PB: predicated region body
PF: predicated region fallthrough
CT: control target
= control target key end

     0   :  { %vm52_vm0 = vcmask 261120   ;;  %s294_s1 = inlined_call_operand.vmem [shape: f32[128,32], index: 1, kind: input, shape index: {}]   ;;  %s295_s0 = inlined_call_operand.vmem [shape: f32[32,32], index: 0, kind: input, shape index: {}]   ;;  %s296_s2 = inlined_call_operand.vmem [shape: f32[1,128], index: 2, kind: input, shape index: {}]   ;;  %s297_s3 = inlined_call_operand.vmem [shape: f32[32,128], index: 3, kind: output, shape index: {}]  }
   0x1   :  { %v19_v0 = vld [vmem:[%s294_s1] sm:$0xff]  ;;  %v20_v1 = vld [vmem:[%s294_s1 + $0x8] sm:$0xff]  ;;  %v21_v2 = vld [vmem:[%s294_s1 + $0x10] sm:$0xff] }
   0x2   :  { %v37_v3 = vpack.c.bf16 %v20_v1, %v19_v0  ;;  %v22_v4 = vld [vmem:[%s294_s1 + $0x18] sm:$0xff]  ;;  %v15_v7 = vld [vmem:[%s295_s0] sm:$0xff]  ;;  %v16_v8 = vld [vmem:[%s295_s0 + $0x8] sm:$0xff] }
   0x3   :  { %v38_v5 = vpack.c.bf16 %v22_v4, %v21_v2  ;;  %v23_v9 = vld [vmem:[%s294_s1 + $0x20] sm:$0xff]  ;;  %v24_v10 = vld [vmem:[%s294_s1 + $0x28] sm:$0xff]  ;;  %v35_v11 = vpack.c.bf16 %v16_v8, %v15_v7  ;;  %v25_v14 = vld [vmem:[%s294_s1 + $0x30] sm:$0xff] }
   0x4   :  { %173 = vmatprep.subr.msk.bf16.mxu0 %vm52_vm0, %v37_v3  ;;  %v60_v6 = vsel %vm52_vm0, %v37_v3, 0  ;;  %v39_v13 = vpack.c.bf16 %v24_v10, %v23_v9  ;;  %v26_v15 = vld [vmem:[%s294_s1 + $0x38] sm:$0xff]  ;;  %v27_v18 = vld [vmem:[%s294_s1 + $0x40] sm:$0xff]  ;;  %v28_v19 = vld [vmem:[%s294_s1 + $0x48] sm:$0xff] }
   0x5   :  { %154 = vmatpush3.bf16.xpose.msra.mxu0 %v60_v6  ;;  %169 = vmatprep.mubr.msk.bf16.mxu0 %vm52_vm0, %v35_v11  ;;  %v63_v12 = vsel %vm52_vm0, %v38_v5, 0  ;;  %v40_v17 = vpack.c.bf16 %v26_v15, %v25_v14  ;;  %v41_v21 = vpack.c.bf16 %v28_v19, %v27_v18  ;;  %v29_v22 = vld [vmem:[%s294_s1 + $0x50] sm:$0xff]  ;;  %v30_v23 = vld [vmem:[%s294_s1 + $0x58] sm:$0xff]  ;;  %v31_v26 = vld [vmem:[%s294_s1 + $0x60] sm:$0xff] }
   0x6   :  { %174 = vmatprep.subr.msk.bf16.mxu0 %vm52_vm0, %v38_v5  ;;  %v66_v16 = vsel %vm52_vm0, %v39_v13, 0  ;;  %v42_v25 = vpack.c.bf16 %v30_v23, %v29_v22  ;;  %v32_v27 = vld [vmem:[%s294_s1 + $0x68] sm:$0xff]  ;;  %v33_v30 = vld [vmem:[%s294_s1 + $0x70] sm:$0xff]  ;;  %v34_v31 = vld [vmem:[%s294_s1 + $0x78] sm:$0xff] }
   0x7   :  { %v69_v20 = vsel %vm52_vm0, %v40_v17, 0  ;;  %v72_v24 = vsel %vm52_vm0, %v41_v21, 0  ;;  %v43_v29 = vpack.c.bf16 %v32_v27, %v31_v26  ;;  %v44_v33 = vpack.c.bf16 %v34_v31, %v33_v30  ;;  %v17_v35 = vld [vmem:[%s295_s0 + $0x10] sm:$0xff]  ;;  %v18_v36 = vld [vmem:[%s295_s0 + $0x18] sm:$0xff]  ;;  %v140_v38 = vld [vmem:[%s296_s2] ss:$0 sm:$0xff] }
   0x8   :  { %v75_v28 = vsel %vm52_vm0, %v42_v25, 0  ;;  %v36_v37 = vpack.c.bf16 %v18_v36, %v17_v35 }
   0x9   :  { %v78_v32 = vsel %vm52_vm0, %v43_v29, 0  ;;  %v81_v34 = vsel %vm52_vm0, %v44_v33, 0 }
   0xd   :  { %156 = vmatpush3.bf16.xpose.msra.mxu0 %v63_v12 }
   0xe   :  { %175 = vmatprep.subr.msk.bf16.mxu0 %vm52_vm0, %v39_v13 }
  0x15   :  { %158 = vmatpush3.bf16.xpose.msra.mxu0 %v66_v16 }
  0x16   :  { %176 = vmatprep.subr.msk.bf16.mxu0 %vm52_vm0, %v40_v17 }
  0x1d   :  { %160 = vmatpush3.bf16.xpose.msra.mxu0 %v69_v20 }
  0x1e   :  { %177 = vmatprep.subr.msk.bf16.mxu0 %vm52_vm0, %v41_v21 }
  0x25   :  { %162 = vmatpush3.bf16.xpose.msra.mxu0 %v72_v24 }
  0x26   :  { %178 = vmatprep.subr.msk.bf16.mxu0 %vm52_vm0, %v42_v25 }
  0x2d   :  { %164 = vmatpush3.bf16.xpose.msra.mxu0 %v75_v28 }
  0x2e   :  { %179 = vmatprep.subr.msk.bf16.mxu0 %vm52_vm0, %v43_v29 }
  0x35   :  { %166 = vmatpush3.bf16.xpose.msra.mxu0 %v78_v32 }
  0x36   :  { %180 = vmatprep.subr.msk.bf16.mxu0 %vm52_vm0, %v44_v33 }
  0x3d   :  { %168 = vmatpush3.bf16.xpose.msra.mxu0 %v81_v34 }
  0x44   :  { %170 = vmatmul.mubr.msk.bf16.vlgmr.msra.gmra.mrb[0].mxu0 %vm52_vm0, %v36_v37 }
 0x117   :  { %v171_v39 = vpop.f32.mrb[0].mxu0 }
 0x118   :  { %v126_v40 = vadd.f32 %v171_v39, %v140_v38  ;;  %v117_v41 = vpop.f32.mrb[1].mxu0 }
 0x119   :  { %v118_v42 = vadd.f32 %v140_v38, %v117_v41  ;;  %v172_v43 = vpop.f32.mrb[2].mxu0 }
 0x11a   :  { %134 = vst [vmem:[%s297_s3 + $0x10] sm:$0xff] %v126_v40  ;;  %v129_v44 = vadd.f32 %v172_v43, %v140_v38  ;;  %v120_v45 = vpop.f32.mrb[3].mxu0 }
 0x11b   :  { %132 = vst [vmem:[%s297_s3] sm:$0xff] %v118_v42  ;;  %v121_v46 = vadd.f32 %v140_v38, %v120_v45 }
 0x11c   :  { %135 = vst [vmem:[%s297_s3 + $0x18] sm:$0xff] %v129_v44 }
 0x11d   :  { %133 = vst [vmem:[%s297_s3 + $0x8] sm:$0xff] %v121_v46 }

// kernel: diffwire_forward.5
= control target key start
LH: loop header
LB: loop body
LE: loop exit
PB: predicated region body
PF: predicated region fallthrough
CT: control target
= control target key end

     0   :  { %vm52_vm0 = vcmask 31744   ;;  %s294_s1 = inlined_call_operand.vmem [shape: f32[128,4], index: 1, kind: input, shape index: {}]   ;;  %s295_s0 = inlined_call_operand.vmem [shape: f32[32,4], index: 0, kind: input, shape index: {}]   ;;  %s296_s2 = inlined_call_operand.vmem [shape: f32[1,128], index: 2, kind: input, shape index: {}]   ;;  %s297_s3 = inlined_call_operand.vmem [shape: f32[32,128], index: 3, kind: output, shape index: {}]  }
   0x1   :  { %v19_v0 = vld [vmem:[%s294_s1] sm:$0xff]  ;;  %v20_v1 = vld [vmem:[%s294_s1 + $0x8] sm:$0xff]  ;;  %v21_v2 = vld [vmem:[%s294_s1 + $0x10] sm:$0xff] }
   0x2   :  { %v37_v3 = vpack.c.bf16 %v20_v1, %v19_v0  ;;  %v22_v4 = vld [vmem:[%s294_s1 + $0x18] sm:$0xff]  ;;  %v15_v7 = vld [vmem:[%s295_s0] sm:$0xff]  ;;  %v16_v8 = vld [vmem:[%s295_s0 + $0x8] sm:$0xff] }
   0x3   :  { %v38_v5 = vpack.c.bf16 %v22_v4, %v21_v2  ;;  %v23_v9 = vld [vmem:[%s294_s1 + $0x20] sm:$0xff]  ;;  %v24_v10 = vld [vmem:[%s294_s1 + $0x28] sm:$0xff]  ;;  %v35_v11 = vpack.c.bf16 %v16_v8, %v15_v7  ;;  %v25_v14 = vld [vmem:[%s294_s1 + $0x30] sm:$0xff] }
   0x4   :  { %173 = vmatprep.subr.msk.bf16.mxu0 %vm52_vm0, %v37_v3  ;;  %v60_v6 = vsel %vm52_vm0, %v37_v3, 0  ;;  %v39_v13 = vpack.c.bf16 %v24_v10, %v23_v9  ;;  %v26_v15 = vld [vmem:[%s294_s1 + $0x38] sm:$0xff]  ;;  %v27_v18 = vld [vmem:[%s294_s1 + $0x40] sm:$0xff]  ;;  %v28_v19 = vld [vmem:[%s294_s1 + $0x48] sm:$0xff] }
   0x5   :  { %154 = vmatpush3.bf16.xpose.msra.mxu0 %v60_v6  ;;  %169 = vmatprep.mubr.msk.bf16.mxu0 %vm52_vm0, %v35_v11  ;;  %v63_v12 = vsel %vm52_vm0, %v38_v5, 0  ;;  %v40_v17 = vpack.c.bf16 %v26_v15, %v25_v14  ;;  %v41_v21 = vpack.c.bf16 %v28_v19, %v27_v18  ;;  %v29_v22 = vld [vmem:[%s294_s1 + $0x50] sm:$0xff]  ;;  %v30_v23 = vld [vmem:[%s294_s1 + $0x58] sm:$0xff]  ;;  %v31_v26 = vld [vmem:[%s294_s1 + $0x60] sm:$0xff] }
   0x6   :  { %174 = vmatprep.subr.msk.bf16.mxu0 %vm52_vm0, %v38_v5  ;;  %v66_v16 = vsel %vm52_vm0, %v39_v13, 0  ;;  %v42_v25 = vpack.c.bf16 %v30_v23, %v29_v22  ;;  %v32_v27 = vld [vmem:[%s294_s1 + $0x68] sm:$0xff]  ;;  %v33_v30 = vld [vmem:[%s294_s1 + $0x70] sm:$0xff]  ;;  %v34_v31 = vld [vmem:[%s294_s1 + $0x78] sm:$0xff] }
   0x7   :  { %v69_v20 = vsel %vm52_vm0, %v40_v17, 0  ;;  %v72_v24 = vsel %vm52_vm0, %v41_v21, 0  ;;  %v43_v29 = vpack.c.bf16 %v32_v27, %v31_v26  ;;  %v44_v33 = vpack.c.bf16 %v34_v31, %v33_v30  ;;  %v17_v35 = vld [vmem:[%s295_s0 + $0x10] sm:$0xff]  ;;  %v18_v36 = vld [vmem:[%s295_s0 + $0x18] sm:$0xff]  ;;  %v140_v38 = vld [vmem:[%s296_s2] ss:$0 sm:$0xff] }
   0x8   :  { %v75_v28 = vsel %vm52_vm0, %v42_v25, 0  ;;  %v36_v37 = vpack.c.bf16 %v18_v36, %v17_v35 }
   0x9   :  { %v78_v32 = vsel %vm52_vm0, %v43_v29, 0  ;;  %v81_v34 = vsel %vm52_vm0, %v44_v33, 0 }
   0xd   :  { %156 = vmatpush3.bf16.xpose.msra.mxu0 %v63_v12 }
   0xe   :  { %175 = vmatprep.subr.msk.bf16.mxu0 %vm52_vm0, %v39_v13 }
  0x15   :  { %158 = vmatpush3.bf16.xpose.msra.mxu0 %v66_v16 }
  0x16   :  { %176 = vmatprep.subr.msk.bf16.mxu0 %vm52_vm0, %v40_v17 }
  0x1d   :  { %160 = vmatpush3.bf16.xpose.msra.mxu0 %v69_v20 }
  0x1e   :  { %177 = vmatprep.subr.msk.bf16.mxu0 %vm52_vm0, %v41_v21 }
  0x25   :  { %162 = vmatpush3.bf16.xpose.msra.mxu0 %v72_v24 }
  0x26   :  { %178 = vmatprep.subr.msk.bf16.mxu0 %vm52_vm0, %v42_v25 }
  0x2d   :  { %164 = vmatpush3.bf16.xpose.msra.mxu0 %v75_v28 }
  0x2e   :  { %179 = vmatprep.subr.msk.bf16.mxu0 %vm52_vm0, %v43_v29 }
  0x35   :  { %166 = vmatpush3.bf16.xpose.msra.mxu0 %v78_v32 }
  0x36   :  { %180 = vmatprep.subr.msk.bf16.mxu0 %vm52_vm0, %v44_v33 }
  0x3d   :  { %168 = vmatpush3.bf16.xpose.msra.mxu0 %v81_v34 }
  0x44   :  { %170 = vmatmul.mubr.msk.bf16.vlgmr.msra.gmra.mrb[0].mxu0 %vm52_vm0, %v36_v37 }
 0x117   :  { %v171_v39 = vpop.f32.mrb[0].mxu0 }
 0x118   :  { %v126_v40 = vadd.f32 %v171_v39, %v140_v38  ;;  %v117_v41 = vpop.f32.mrb[1].mxu0 }
 0x119   :  { %v118_v42 = vadd.f32 %v140_v38, %v117_v41  ;;  %v172_v43 = vpop.f32.mrb[2].mxu0 }
 0x11a   :  { %134 = vst [vmem:[%s297_s3 + $0x10] sm:$0xff] %v126_v40  ;;  %v129_v44 = vadd.f32 %v172_v43, %v140_v38  ;;  %v120_v45 = vpop.f32.mrb[3].mxu0 }
 0x11b   :  { %132 = vst [vmem:[%s297_s3] sm:$0xff] %v118_v42  ;;  %v121_v46 = vadd.f32 %v140_v38, %v120_v45 }
 0x11c   :  { %135 = vst [vmem:[%s297_s3 + $0x18] sm:$0xff] %v129_v44 }
 0x11d   :  { %133 = vst [vmem:[%s297_s3 + $0x8] sm:$0xff] %v121_v46 }

// kernel: diffwire_forward.8
= control target key start
LH: loop header
LB: loop body
LE: loop exit
PB: predicated region body
PF: predicated region fallthrough
CT: control target
= control target key end

     0   :  { %s814_s27 = smov 0   ;;  %s895_s0 = inlined_call_operand.vmem [shape: bf16[2,16,16], index: 0, kind: input, shape index: {}]   ;;  %s896_s1 = inlined_call_operand.vmem [shape: f32[2,16,32], index: 1, kind: input, shape index: {}]   ;;  %s897_s2 = inlined_call_operand.vmem [shape: f32[32,32], index: 2, kind: input, shape index: {}]   ;;  %s898_s3 = inlined_call_operand.vmem [shape: f32[1,32], index: 3, kind: input, shape index: {}]   ;;  %s899_s4 = inlined_call_operand.vmem [shape: f32[32,32], index: 4, kind: input, shape index: {}]   ;;  %s900_s5 = inlined_call_operand.vmem [shape: f32[16,32], index: 5, kind: input, shape index: {}]   ;;  %s901_s6 = inlined_call_operand.vmem [shape: f32[1,16], index: 6, kind: input, shape index: {}]   ;;  %s902_s7 = inlined_call_operand.vmem [shape: f32[2,16,32], index: 7, kind: output, shape index: {0}]   ;;  %s903_s8 = inlined_call_operand.vmem [shape: f32[2,16,16], index: 8, kind: output, shape index: {1}]  }
   0x1 LB: > { %s680_s28 = sadd.s32 4294967295, %s765_s27   ;;  %p684_p0 = scmp.ge.s32.totalorder %s765_s27, 1  ;;  %s765_s27 = sphi %s814_s27, %s19_s27  }
   0x2   : > { %p275_p1 = scmp.lt.s32.totalorder %s765_s27, 3 }
   0x4   : > { %p276_p2 = pnand %p684_p0, %p275_p1 }
   0x5   : > { %p319_p3 = scmp.lt.s32.totalorder (!%p276_p2), %s680_s28, 1  ;;  %v767_v0 = vmov (!%p276_p2), 0.0   ;;  %vm768_vm0 = vmmov (!%p276_p2), 0   ;;  %vm409_vm1 = vcmask (!%p276_p2), 261120   ;;  %v395_v1 = vld [vmem:[%s897_s2] sm:$0xff] (!%p276_p2)  ;;  %v396_v2 = vld [vmem:[%s897_s2 + $0x8] sm:$0xff] (!%p276_p2) }
   0x6   : > { %279 = sbr.rel (%p276_p2) target bundleno = 675 (0x2a3), region = 48  ;;  %716 = vmatprep.subr.bf16.mxu1 (!%p276_p2), %v767_v0  ;;  %718 = vmatprep.mubr.msk.bf16.mxu1 (!%p276_p2), %vm768_vm0, %v767_v0  ;;  %v400_v3 = vpack.c.bf16 (!%p276_p2), %v396_v2, %v395_v1  ;;  %v397_v4 = vld [vmem:[%s897_s2 + $0x10] sm:$0xff] (!%p276_p2)  ;;  %v398_v5 = vld [vmem:[%s897_s2 + $0x18] sm:$0xff] (!%p276_p2)  ;;  %v460_v12 = vld [vmem:[%s899_s4] sm:$0xff] (!%p276_p2)  ;;  %vm350_vm2 = vcmask (!%p276_p2), 130048  }
   0x7   : > { %722 = vmatprep.subr.bf16.mxu0 (!%p276_p2), %v767_v0  ;;  %726 = vmatprep.mubr.msk.bf16.mxu0 (!%p276_p2), %vm768_vm0, %v767_v0  ;;  %v401_v9 = vpack.c.bf16 (!%p276_p2), %v398_v5, %v397_v4  ;;  %v461_v13 = vld [vmem:[%s899_s4 + $0x8] sm:$0xff] (!%p276_p2)  ;;  %v462_v17 = vld [vmem:[%s899_s4 + $0x10] sm:$0xff] (!%p276_p2)  ;;  %v463_v18 = vld [vmem:[%s899_s4 + $0x18] sm:$0xff] (!%p276_p2) }
   0x8   : > { %v414_v6 = vsel (!%p276_p2), %vm409_vm1, %v400_v3, 0  ;;  %v464_v15 = vpack.c.bf16 (!%p276_p2), %v461_v13, %v460_v12  ;;  %v465_v19 = vpack.c.bf16 (!%p276_p2), %v463_v18, %v462_v17  ;;  %v520_v28 = vld [vmem:[%s900_s5] sm:$0xff] (!%p276_p2)  ;;  %v521_v29 = vld [vmem:[%s900_s5 + $0x8] sm:$0xff] (!%p276_p2) }
   0x9   : > { %723 = vmatpush3.bf16.xpose.msra.mxu0 (!%p276_p2), %v414_v6  ;;  %v417_v14 = vsel (!%p276_p2), %vm409_vm1, %v401_v9, 0  ;;  %v523_v30 = vpack.c.bf16 (!%p276_p2), %v521_v29, %v520_v28  ;;  %v695_v34 = vld [vmem:[%s898_s3] ss:$0 sm:$0xff] (!%p276_p2) }
   0xa   : > { %724 = vmatprep.subr.bf16.mxu0 (!%p276_p2), %v767_v0  ;;  %v470_v16 = vsel (!%p276_p2), %vm409_vm1, %v464_v15, 0  ;;  %v473_v20 = vsel (!%p276_p2), %vm409_vm1, %v465_v19, 0  ;;  %v698_v44 = vld [vmem:[%s901_s6] ss:$0 sm:$0xff] (!%p276_p2) }
   0xb   : > { %v535_v32 = vsel (!%p276_p2), %vm409_vm1, %v523_v30, 0 }
   0xd   : > { %s905_s28 = smov (!%p319_p3, %s680_s28), 1 }
   0xe   : > { %s836_s15 = sshll.u32 %s905_s28, 4  ;;  %s702_s16 = sshll.u32 %s905_s28, 3 }
   0xf   : > { %s328_s19 = scalar_lea.vmem %s896_s1, %s836_s15  ;;  %s323_s22 = scalar_lea.vmem %s895_s0, %s702_s16 }
  0x10   : > { %v342_v7 = vld [vmem:[%s328_s19] sm:$0xff]  ;;  %v343_v8 = vld [vmem:[%s328_s19 + $0x8] sm:$0xff]  ;;  %s333_s19 = scalar_lea.vmem %s902_s7, %s836_s15  ;;  %s338_s24 = scalar_lea.vmem %s903_s8, %s836_s15 }
  0x11   : > { %v344_v10 = vpack.c.bf16 %v343_v8, %v342_v7  ;;  %v758_v11 = vld [vmem:[%s323_s22] sm:$0xff]   ;;  %725 = vmatpush3.bf16.xpose.msra.mxu0 %v417_v14 }
  0x12   : > { %738 = vmatprep.subr.bf16.mxu0 %v767_v0 }
  0x13   : > { %717 = vmatpush3.bf16.msra.mxu1 %v344_v10 }
  0x14   : > { %730 = vmatprep.subr.bf16.mxu1 %v767_v0 }
  0x16   : > { %719 = vmatmul.mubr.msk.bf16.vlgmr.msra.gmra.mrb[0].mxu1 %vm350_vm2, %v758_v11 }
  0x17   : > { %734 = vmatprep.mubr.msk.bf16.mxu1 %vm768_vm0, %v767_v0 }
  0x1c   : > { %731 = vmatpush3.bf16.xpose.msra.mxu1 %v470_v16 }
  0x1d   : > { %732 = vmatprep.subr.bf16.mxu1 %v767_v0 }
  0x24   : > { %733 = vmatpush3.bf16.xpose.msra.mxu1 %v473_v20 }
  0x2b   : > { %735 = vmatmul.mubr.msk.bf16.vlgmr.msra.gmra.mrb[4].mxu1 %vm409_vm1, %v344_v10 }
  0xe9   : > { %v388_v21 = vpop.f32.mrb[0].mxu1 }
  0xea   : > { %v720_v22 = vpop.f32.mrb[1].mxu1 }
  0xeb   : > { %v391_v23 = vpop.f32.mrb[2].mxu1 }
  0xec   : > { %v399_v24 = vpack.c.bf16 %v391_v23, %v388_v21  ;;  %v721_v25 = vpop.f32.mrb[3].mxu1 }
  0xee   : > { %727 = vmatmul.mubr.msk.bf16.vlgmr.msra.gmra.mrb[0].mxu0 %vm409_vm1, %v399_v24 }
  0xef   : > { %740 = vmatprep.mubr.msk.bf16.mxu0 %vm768_vm0, %v767_v0  ;;  %739 = vmatpush3.bf16.xpose.msra.mxu0 %v535_v32 }
  0xfe   : > { %v509_v26 = vpop.f32.mrb[4].mxu1 }
  0xff   : > { %v736_v27 = vpop.f32.mrb[5].mxu1 }
 0x100   : > { %v512_v31 = vpop.f32.mrb[6].mxu1 }
 0x101   : > { %v737_v33 = vpop.f32.mrb[7].mxu1 }
 0x1c1   : > { %v453_v35 = vpop.f32.mrb[0].mxu0 }
 0x1c2   : > { %v454_v36 = vadd.f32 %v695_v34, %v453_v35  ;;  %v728_v37 = vpop.f32.mrb[1].mxu0 }
 0x1c3   : > { %v456_v38 = vpop.f32.mrb[2].mxu0 }
 0x1c4   : > { %v516_v39 = vadd.f32 %v509_v26, %v454_v36  ;;  %v457_v40 = vadd.f32 %v695_v34, %v456_v38  ;;  %v729_v41 = vpop.f32.mrb[3].mxu0 }
 0x1c6   : > { %518 = vst.msk [vmem:[%s333_s19] sm:$0xff] %vm409_vm1, %v516_v39  ;;  %v517_v42 = vadd.f32 %v512_v31, %v457_v40 }
 0x1c8   : > { %519 = vst.msk [vmem:[%s333_s19 + $0x8] sm:$0xff] %vm409_vm1, %v517_v42  ;;  %v522_v43 = vpack.c.bf16 %v517_v42, %v516_v39 }
 0x1ca   : > { %741 = vmatmul.mubr.msk.bf16.vlgmr.msra.gmra.mrb[4].mxu0 %vm409_vm1, %v522_v43 }
 0x29d   : > { %v571_v45 = vpop.f32.mrb[4].mxu0 }
 0x29e   : > { %v572_v46 = vadd.f32 %v698_v44, %v571_v45  ;;  %v742_v47 = vpop.f32.mrb[5].mxu0 }
 0x29f   : > { %v574_v48 = vpop.f32.mrb[6].mxu0 }
 0x2a0   : > { %578 = vst.msk [vmem:[%s338_s24] sm:$0xff] %vm350_vm2, %v572_v46  ;;  %v575_v49 = vadd.f32 %v698_v44, %v574_v48  ;;  %v743_v50 = vpop.f32.mrb[7].mxu0 }
 0x2a2   : > { %579 = vst.msk [vmem:[%s338_s24 + $0x8] sm:$0xff] %vm350_vm2, %v575_v49 }
 0x2a3 PF: > { %s19_s27 = sadd.s32 1, %s765_s27  }
 0x2a4   : > { %p16_p4 = scmp.ge.s32.totalorder %s19_s27, 4  }
 0x2a6   :  { %18 = sbr.rel (!%p16_p4) target bundleno = 1 (0x1), region = 93 }

// kernel: diffwire_forward.7
= control target key start
LH: loop header
LB: loop body
LE: loop exit
PB: predicated region body
PF: predicated region fallthrough
CT: control target
= control target key end

     0   :  { %s1393_s24 = smov 0   ;;  %s1611_s0 = inlined_call_operand.vmem [shape: bf16[2,16,16], index: 0, kind: input, shape index: {}]   ;;  %s1612_s1 = inlined_call_operand.vmem [shape: f32[2,16,2], index: 1, kind: input, shape index: {}]   ;;  %s1613_s2 = inlined_call_operand.vmem [shape: f32[2,16,8], index: 2, kind: input, shape index: {}]   ;;  %s1614_s3 = inlined_call_operand.vmem [shape: f32[2,16,1], index: 3, kind: input, shape index: {}]   ;;  %s1615_s4 = inlined_call_operand.vmem [shape: bf16[2,16,16], index: 4, kind: output, shape index: {0}]   ;;  %s1616_s5 = inlined_call_operand.vmem [shape: f32[2,2,2], index: 5, kind: output, shape index: {1}]   ;;  %s1617_s6 = inlined_call_operand.vmem [shape: f32[2,8,8], index: 6, kind: output, shape index: {2}]   ;;  %s1618_s7 = inlined_call_operand.vmem [shape: f32[2,1,4], index: 7, kind: output, shape index: {3}]  }
   0x1 LB: > { %s1213_s25 = sadd.s32 4294967295, %s1347_s24   ;;  %p1217_p0 = scmp.ge.s32.totalorder %s1347_s24, 1  ;;  %s1347_s24 = sphi %s1393_s24, %s18_s24  }
   0x2   : > { %p274_p1 = scmp.lt.s32.totalorder %s1347_s24, 3 }
   0x4   : > { %p275_p2 = pnand %p1217_p0, %p274_p1 }
   0x5   : > { %p332_p3 = scmp.lt.s32.totalorder (!%p275_p2), %s1213_s25, 1  ;;  %vm377_vm0 = vcmask (!%p275_p2), 15360   ;;  %v1349_v4 = vmov (!%p275_p2), 0   ;;  %v1350_v17 = vmov (!%p275_p2), 0.0   ;;  %vm1351_vm1 = vmmov (!%p275_p2), 0   ;;  %s1352_s17 = smov (!%p275_p2), 127  }
   0x6   : > { %278 = sbr.rel (%p275_p2) target bundleno = 1197 (0x4ad), region = 36  ;;  %1314 = vset.pattern.permute.xlu1 (!%p275_p2), %v1349_v4  ;;  %1313 = vset.pattern.permute.xlu0 (!%p275_p2), %v1349_v4  ;;  %vm418_vm2 = vcmask (!%p275_p2), 130048   ;;  %vm584_vm3 = vcmask (!%p275_p2), 7168   ;;  %vm747_vm14 = vcmask (!%p275_p2), 64512  }
   0x7   : > { %1264 = vmatprep.subr.bf16.mxu0 (!%p275_p2), %v1350_v17  ;;  %1270 = vmatprep.subr.bf16.mxu1 (!%p275_p2), %v1350_v17 }
   0x8   : > { %1266 = vmatprep.mubr.msk.bf16.mxu0 (!%p275_p2), %vm1351_vm1, %v1350_v17  ;;  %1272 = vmatprep.mubr.msk.bf16.mxu1 (!%p275_p2), %vm1351_vm1, %v1350_v17 }
   0xd   : > { %s1624_s25 = smov (!%p332_p3, %s1213_s25), 1 }
   0xe   : > { %s1404_s26 = sshll.u32 %s1624_s25, 4  ;;  %s1431_s10 = sshll.u32 %s1624_s25, 3 }
   0xf   : > { %s341_s29 = scalar_lea.vmem %s1612_s1, %s1404_s26  ;;  %s351_s9 = scalar_lea.vmem %s1614_s3, %s1404_s26 }
  0x10   : > { %v375_v0 = vld [vmem:[%s341_s29] sm:$0xff]  ;;  %v376_v1 = vld [vmem:[%s341_s29 + $0x8] sm:$0xff]  ;;  %s346_s13 = scalar_lea.vmem %s1613_s2, %s1404_s26  ;;  %s336_s16 = scalar_lea.vmem %s1611_s0, %s1431_s10 }
  0x11   : > { %v378_v2 = vsel %vm377_vm0, %v375_v0, -inf  ;;  %v381_v3 = vsel %vm377_vm0, %v376_v1, -inf  ;;  %v1416_v5 = vld [vmem:[%s351_s9] sm:$0xff]  ;;  %v1421_v16 = vld [vmem:[%s351_s9 + $0x8] sm:$0xff]  ;;  %s1228_s18 = sshll.u32 %s1624_s25, 1  ;;  %s364_s26 = scalar_lea.vmem %s1617_s6, %s1431_s10 }
  0x12   : > { %379 = vmax.xlane.f32.xlu0 %v378_v2  ;;  %v690_v26 = vld [vmem:[%s346_s13 + $0x8] sm:$0xff]  ;;  %v689_v28 = vld [vmem:[%s346_s13] sm:$0xff]  ;;  %v585_v35 = vsel %vm584_vm3, %v1416_v5, 0.0  ;;  %v586_v36 = vsel %vm584_vm3, %v1421_v16, 0.0  ;;  %vm574_vm4 = vcmp.gt.f32.partialorder %v1416_v5, 0.5  ;;  %vm575_vm7 = vcmp.gt.f32.partialorder %v1421_v16, 0.5  ;;  %s360_s21 = scalar_lea.vmem %s1616_s5, %s1228_s18  ;;  %s367_s29 = scalar_lea.vmem %s1618_s7, %s1624_s25 }
  0x13   : > { %v1446_v30 = vld [vmem:[%s336_s16] sm:$0xff]   ;;  %v587_v37 = vadd.f32 %v586_v36, %v585_v35  ;;  %v675_v35 = vlaneseq  ;;  %s356_s8 = scalar_lea.vmem %s1615_s4, %s1431_s10 }
  0x15   : > { %v588_v38 = vrot.slane %v587_v37, 4 }
  0x16   : > { %382 = vmax.xlane.f32.xlu0 %v381_v3 }
  0x17   : > { %v589_v41 = vadd.f32 %v588_v38, %v587_v37  ;;  %v1509_v37 = vshrl.u32 %v675_v35, 7 }
  0x19   : > { %v590_v45 = vrot.slane %v589_v41, 2 }
  0x1b   : > { %v591_v50 = vadd.f32 %v590_v45, %v589_v41 }
  0x1d   : > { %v592_v53 = vrot.slane %v591_v50, 1 }
  0x1f   : > { %v593_v56 = vadd.f32 %v592_v53, %v591_v50 }
  0x2c   : > { %402 = vperm.xlu0 %1313, %v1416_v5  }
  0x9f   : > { %v380_v6 = vpop.xlane.xlu0 %379 }
  0xa0   : > { %v384_v7 = vsub.f32 %v375_v0, %v380_v6 }
  0xa2   : > { %v386_v8 = vmul.f32 1.442695, %v384_v7 }
  0xa3   : > { %v383_v9 = vpop.xlane.xlu0 %382 }
  0xa4   : > { %1317 = vpow2.f32 %v386_v8  ;;  %v385_v10 = vsub.f32 %v376_v1, %v383_v9 }
  0xa6   : > { %v388_v11 = vmul.f32 1.442695, %v385_v10 }
  0xa8   : > { %1319 = vpow2.f32 %v388_v11 }
  0xab   : > { %v403_v21 = vpop.permute.xlu0 %402 }
  0xac   : > { %v1450_v32 = vmul.f32 %v689_v28, %v403_v21 }
  0xae   : > { %v1318_v12 = vpop.eup %1317 }
  0xaf   : > { %v390_v13 = vsel %vm377_vm0, %v1318_v12, 0.0 }
  0xb0   : > { %391 = vadd.xlane.f32.xlu1 %v390_v13 }
  0xb2   : > { %v1320_v14 = vpop.eup %1319 }
  0xb3   : > { %v393_v15 = vsel %vm377_vm0, %v1320_v14, 0.0 }
  0xb4   : > { %394 = vadd.xlane.f32.xlu1 %v393_v15 }
  0xc5   : > { %407 = vperm.xlu1 %1314, %v1421_v16  }
 0x13d   : > { %v392_v18 = vpop.xlane.xlu1 %391 }
 0x13e   : > { %1321 = vrcp.f32 %v392_v18 }
 0x141   : > { %v395_v19 = vpop.xlane.xlu1 %394 }
 0x142   : > { %1323 = vrcp.f32 %v395_v19 }
 0x145   : > { %v408_v27 = vpop.permute.xlu1 %407 }
 0x146   : > { %v1448_v31 = vmul.f32 %v690_v26, %v408_v27 }
 0x148   : > { %v1322_v20 = vpop.eup %1321  ;;  %v1463_v34 = vpack.c.bf16 %v1448_v31, %v1450_v32 }
 0x149   : > { %v397_v22 = vmul.f32 %v1322_v20, %v1318_v12 }
 0x14b   : > { %v1437_v23 = vmul.f32 %v403_v21, %v397_v22 }
 0x14c   : > { %v1324_v24 = vpop.eup %1323 }
 0x14d   : > { %v399_v25 = vmul.f32 %v1324_v24, %v1320_v14  ;;  %566 = vrot.lane.b32.xlu1 %v1437_v23, %s1352_s17 }
 0x14f   : > { %v1444_v29 = vmul.f32 %v408_v27, %v399_v25  ;;  %v761_v27 = vmul.f32 %v1450_v32, %v1450_v32 }
 0x151   : > { %568 = vrot.lane.b32.xlu1 %v1444_v29, %s1352_s17  ;;  %v1455_v33 = vpack.c.bf16 %v1444_v29, %v1437_v23 }
 0x153   : > { %1265 = vmatpush3.bf16.msra.mxu0 %v1455_v33  ;;  %1271 = vmatpush3.bf16.msra.mxu1 %v1455_v33 }
 0x154   : > { %1276 = vmatprep.subr.bf16.mxu0 %v1350_v17  ;;  %1282 = vmatprep.subr.bf16.mxu1 %v1350_v17 }
 0x156   : > { %1267 = vmatmul.mubr.msk.bf16.vlgmr.msra.gmra.mrb[0].mxu0 %vm418_vm2, %v1446_v30 }
 0x157   : > { %1277 = vmatpush3.bf16.msra.mxu0 %v1463_v34  ;;  %1278 = vmatprep.mubr.msk.bf16.mxu0 %vm1351_vm1, %v1350_v17 }
 0x1bf   : > { %v567_v39 = vpop.permute.xlu1 %566 }
 0x1c0   : > { %vm572_vm5 = vcmp.ge.f32.partialorder %v1437_v23, %v567_v39  ;;  %v677_v39 = vsub.s32 0, %v1509_v37 }
 0x1c1   : > { %vm1476_vm6 = vmand %vm572_vm5, %vm574_vm4 }
 0x1c2   : > { %v1233_v43 = vsel %vm1476_vm6, 1.0, %v1350_v17 }
 0x1c3   : > { %v569_v42 = vpop.permute.xlu1 %568  ;;  %v596_v47 = vsel %vm584_vm3, %v1233_v43, 0.0  ;;  %v1516_v43 = vunpack.c.h.bf16 %v1446_v30 }
 0x1c4   : > { %vm573_vm8 = vcmp.ge.f32.partialorder %v1444_v29, %v569_v42  ;;  %v371_v42 = vunpack.c.l.bf16 %v1446_v30 }
 0x1c5   : > { %vm1485_vm9 = vmand %vm573_vm8, %vm575_vm7  ;;  %vm1033_vm7 = vcmask 24576  }
 0x1c6   : > { %v1234_v46 = vsel %vm1485_vm9, 1.0, %v1350_v17 }
 0x1c7   : > { %v597_v48 = vsel %vm584_vm3, %v1234_v46, 0.0  ;;  %vm1296_vm3 = vmpackc.low %vm747_vm14, %vm747_vm14 }
 0x1c8   : > { %v598_v49 = vadd.f32 %v597_v48, %v596_v47 }
 0x1ca   : > { %v599_v51 = vrot.slane %v598_v49, 4 }
 0x1cc   : > { %v600_v52 = vadd.f32 %v599_v51, %v598_v49 }
 0x1ce   : > { %v601_v54 = vrot.slane %v600_v52, 2 }
 0x1d0   : > { %v602_v55 = vadd.f32 %v601_v54, %v600_v52 }
 0x1d2   : > { %v603_v57 = vrot.slane %v602_v55, 1 }
 0x1d4   : > { %v604_v58 = vadd.f32 %v603_v57, %v602_v55 }
 0x1d6   : > { %v605_v59 = vsub.f32 %v593_v56, %v604_v58  ;;  %v606_v60 = vmul.f32 %v604_v58, %v593_v56 }
 0x1d8   : > { %v607_v61 = vadd.f32 1e-15, %v606_v60  ;;  %v617_v62 = vmul.f32 %v605_v59, %v593_v56  ;;  %v762_v56 = vmul.f32 %v1448_v31, %v1448_v31 }
 0x1da   : > { %1325 = vrcp.f32 %v607_v61  ;;  %v618_v63 = vadd.f32 1e-15, %v617_v62  ;;  %v766_v57 = vsel %vm747_vm14, %v762_v56, 0.0 }
 0x1dc   : > { %1327 = vrcp.f32 %v618_v63 }
 0x1e4   : > { %v1326_v0 = vpop.eup %1325 }
 0x1e5   : > { %v609_v1 = vmul.f32 %v1326_v0, %v605_v59 }
 0x1e6   : > { %v1328_v2 = vpop.eup %1327 }
 0x1e7   : > { %1329 = vrsqrt.f32 %v609_v1  ;;  %v620_v3 = vmul.f32 %v1328_v2, %v604_v58  ;;  %vm612_vm10 = vcmp.eq.f32.partialorder %v609_v1, inf  ;;  %v615_v12 = vand.u32 2147483648, %v609_v1 }
 0x1e8   : > { %vm614_vm13 = vcmp.eq.f32.partialorder %v609_v1, 0.0  ;;  %v478_v58 = vsel %vm418_vm2, %v371_v42, 0.0 }
 0x1e9   : > { %1331 = vrsqrt.f32 %v620_v3  ;;  %vm623_vm11 = vcmp.eq.f32.partialorder %v620_v3, inf  ;;  %v626_v9 = vand.u32 2147483648, %v620_v3  ;;  %vm625_vm12 = vcmp.eq.f32.partialorder %v620_v3, 0.0 }
 0x1f1   : > { %v1330_v4 = vpop.eup %1329 }
 0x1f2   : > { %v611_v6 = vmul.f32 %v1330_v4, %v609_v1 }
 0x1f3   : > { %v1332_v7 = vpop.eup %1331 }
 0x1f4   : > { %v622_v8 = vmul.f32 %v1332_v7, %v620_v3  ;;  %v613_v10 = vsel %vm612_vm10, %v609_v1, %v611_v6 }
 0x1f5   : > { %v616_v15 = vsel %vm614_vm13, %v615_v12, %v613_v10 }
 0x1f6   : > { %v624_v11 = vsel %vm623_vm11, %v620_v3, %v622_v8 }
 0x1f7   : > { %v627_v13 = vsel %vm625_vm12, %v626_v9, %v624_v11  ;;  %vm1020_vm12 = vcmask 125952  }
 0x1f8   : > { %v628_v14 = vsub.f32 0.0, %v627_v13 }
 0x1fa   : > { %v629_v18 = vsel %vm1476_vm6, %v616_v15, %v628_v14  ;;  %v630_v20 = vsel %vm1485_vm9, %v616_v15, %v628_v14 }
 0x1fb   : > { %v631_v19 = vmul.f32 %v629_v18, %v1416_v5  ;;  %v632_v21 = vmul.f32 %v630_v20, %v1421_v16  ;;  %v763_v5 = vsel %vm747_vm14, %v761_v27, 0.0  ;;  %v481_v27 = vsel %vm418_vm2, %v1516_v43, 0.0 }
 0x1fd   : > { %667 = vperm.xlu1 %1314, %v631_v19  }
 0x201   : > { %672 = vperm.xlu1 %1314, %v632_v21  }
 0x229   : > { %v1500_v22 = vpop.f32.mrb[0].mxu0 }
 0x22a   : > { %v1268_v24 = vpop.f32.mrb[1].mxu0  ;;  %633 = vxpose.xlu1.b32.start [1/2] (short) (narrow) %v631_v19, 8 }
 0x22b   : > { %v459_v25 = vpop.f32.mrb[2].mxu0 }
 0x22c   : > { %v1269_v26 = vpop.f32.mrb[3].mxu0  ;;  %v464_v28 = vmul.f32 %v459_v25, %v1444_v29 }
 0x22e   : > { %634 = vxpose.xlu1.b32.end [2/2] (short) (narrow) %v632_v21, 8  ;;  %v468_v16 = vsel %vm377_vm0, %v464_v28, 0.0 }
 0x255   : > { %764 = vadd.xlane.f32.xlu1 %v763_v5  ;;  %v484_v5 = vmul.f32 %v1437_v23, %v1437_v23 }
 0x257   : > { %v486_v28 = vsel %vm377_vm0, %v484_v5, 0.0 }
 0x27c   : > { %v668_v36 = vpop.permute.xlu1 %667 }
 0x280   : > { %v673_v38 = vpop.permute.xlu1 %672 }
 0x282   : > { %781 = vxpose.xlu1.c.b16.start.end [1/1] (short) (narrow) %v1463_v34, 16 }
 0x28f   : > { %469 = vadd.xlane.f32.xlu1 %v468_v16  ;;  %v485_v16 = vmul.f32 %v1444_v29, %v1444_v29 }
 0x2aa   : > { %v649_v40 = vpop.trf.xlu1 }
 0x2ab   : > { %v678_v41 = vrot.slane %v649_v40, %v677_v39  ;;  %v463_v40 = vmul.f32 %v1500_v22, %v1437_v23 }
 0x2ad   : > { %v679_v44 = vsub.f32 %v668_v36, %v678_v41  ;;  %v680_v45 = vsub.f32 %v673_v38, %v678_v41 }
 0x2af   : > { %v681_v46 = vmul.f32 %v679_v44, %v679_v44  ;;  %v682_v47 = vmul.f32 %v680_v45, %v680_v45  ;;  %v465_v45 = vsel %vm377_vm0, %v463_v40, 0.0 }
 0x2b1   : > { %v683_v48 = vmul.f32 %v681_v46, %v371_v42  ;;  %v684_v49 = vmul.f32 %v682_v47, %v1516_v43 }
 0x2b3   : > { %v686_v50 = vsub.f32 %v1516_v43, %v684_v49  ;;  %v685_v51 = vsub.f32 %v371_v42, %v683_v48  ;;  %v489_v42 = vsel %vm377_vm0, %v485_v16, 0.0  ;;  %vm562_vm0 = vcmask 9216  }
 0x2b5   : > { %v1520_v52 = vmax.f32 %v686_v50, 0.0  ;;  %v1522_v53 = vmax.f32 %v685_v51, 0.0 }
 0x2b7   : > { %v693_v54 = vsel %vm418_vm2, %v1522_v53, 0.0  ;;  %v699_v30 = vpack.c.bf16 %v1520_v52, %v1522_v53  ;;  %v696_v55 = vsel %vm418_vm2, %v1520_v52, 0.0 }
 0x2b8   : > { %694 = vadd.xlane.f32.xlu0 %v693_v54 }
 0x2b9   : > { %1279 = vmatmul.mubr.msk.bf16.vlgmr.msra.gmra.mrb[4].mxu0 %vm418_vm2, %v699_v30 }
 0x2bc   : > { %697 = vadd.xlane.f32.xlu0 %v696_v55 }
 0x2c0   : > { %767 = vadd.xlane.f32.xlu0 %v766_v57 }
 0x2e2   : > { %v765_v62 = vpop.xlane.xlu1 %764 }
 0x2e8   : > { %v789_v9 = vpop.trf.xlu1 }
 0x2ed   : > { %503 = vxpose.xlu0.c.b16.start.end [1/1] (short) (narrow) %v1455_v33, 16 }
 0x2fa   : > { %479 = vadd.xlane.f32.xlu0 %v478_v58 }
 0x31c   : > { %v470_v30 = vpop.xlane.xlu1 %469 }
 0x345   : > { %v695_v59 = vpop.xlane.xlu0 %694 }
 0x346   : > { %v769_v0 = vmul.f32 %v765_v62, %v695_v59 }
 0x349   : > { %v698_v60 = vpop.xlane.xlu0 %697 }
 0x34a   : > { %v1536_v61 = vadd.f32 %v698_v60, %v695_v59 }
 0x34d   : > { %v768_v63 = vpop.xlane.xlu0 %767 }
 0x34e   : > { %v770_v1 = vmul.f32 %v768_v63, %v698_v60 }
 0x350   : > { %v773_v2 = vadd.f32 %v770_v1, %v769_v0 }
 0x352   : > { %v774_v3 = vrot.slane %v773_v2, 4 }
 0x353   : > { %v511_v4 = vpop.trf.xlu0 }
 0x354   : > { %v775_v6 = vadd.f32 %v774_v3, %v773_v2  ;;  %1273 = vmatmul.mubr.msk.bf16.vlgmr.msra.gmra.mrb[0].mxu1 %vm418_vm2, %v511_v4 }
 0x355   : > { %1283 = vmatpush3.bf16.msra.mxu1 %v1463_v34  ;;  %1284 = vmatprep.mubr.msk.bf16.mxu1 %vm1351_vm1, %v1350_v17 }
 0x356   : > { %v776_v33 = vrot.slane %v775_v6, 2 }
 0x358   : > { %v777_v7 = vadd.f32 %v776_v33, %v775_v6 }
 0x35a   : > { %v778_v8 = vrot.slane %v777_v7, 1 }
 0x35c   : > { %v1542_v10 = vadd.f32 %v778_v8, %v777_v7  ;;  %1285 = vmatmul.mubr.msk.bf16.vlgmr.msra.gmra.mrb[4].mxu1 %vm418_vm2, %v789_v9 }
 0x35e   : > { %1333 = vrsqrt.f32 %v1542_v10  ;;  %vm852_vm15 = vcmp.eq.f32.partialorder %v1542_v10, inf  ;;  %v855_v34 = vand.u32 2147483648, %v1542_v10  ;;  %vm854_vm1 = vcmp.eq.f32.partialorder %v1542_v10, 0.0 }
 0x368   : > { %v1334_v11 = vpop.eup %1333 }
 0x369   : > { %v851_v12 = vmul.f32 %v1334_v11, %v1542_v10 }
 0x36b   : > { %v853_v13 = vsel %vm852_vm15, %v1542_v10, %v851_v12  ;;  %v1024_v12 = vand.u32 127, %v675_v35 }
 0x36c   : > { %v856_v17 = vsel %vm854_vm1, %v855_v34, %v853_v13 }
 0x36d   : > { %v857_v14 = vadd.f32 1e-15, %v856_v17  ;;  %vm1025_vm2 = vcmp.eq.s32.totalorder %v1024_v12, 0  ;;  %vm1027_vm4 = vcmp.eq.s32.totalorder %v1024_v12, 1  ;;  %vm1029_vm5 = vcmp.eq.s32.totalorder %v1024_v12, 2 }
 0x36e   : > { %vm1031_vm6 = vcmp.eq.s32.totalorder %v1024_v12, 3 }
 0x36f   : > { %1335 = vrcp.f32 %v857_v14 }
 0x379   : > { %v1336_v15 = vpop.eup %1335 }
 0x37a   : > { %v859_v18 = vmul.f32 %v1336_v15, %v1450_v32  ;;  %v860_v19 = vmul.f32 %v1336_v15, %v1448_v31 }
 0x37c   : > { %1292 = vmatprep.mubr.msk.f32.mxu0 %vm747_vm14, %v859_v18  ;;  %v1295_v20 = vpack.c.bf16 %v860_v19, %v859_v18  ;;  %v942_v21 = vmul.f32 %v859_v18, %v859_v18  ;;  %v943_v25 = vmul.f32 %v860_v19, %v860_v19 }
 0x37e   : > { %1297 = vmatprep.subr.msk.bf16.mxu0 %vm1296_vm3, %v1295_v20  ;;  %v944_v24 = vsel %vm747_vm14, %v942_v21, 0.0  ;;  %v947_v26 = vsel %vm747_vm14, %v943_v25, 0.0 }
 0x37f   : > { %1300 = vmatpush3.bf16.xpose.msk.msra.mxu0 %vm1296_vm3, %v1295_v20  ;;  %945 = vadd.xlane.f32.xlu0 %v944_v24 }
 0x383   : > { %948 = vadd.xlane.f32.xlu0 %v947_v26 }
 0x386   : > { %1293 = vmatmul.mubr.msk.f32.vlgmr.msra.gmra.mrb[8].mxu0 %vm747_vm14, %v860_v19 }
 0x387   : > { %482 = vadd.xlane.f32.xlu0 %v481_v27  ;;  %v480_v23 = vpop.xlane.xlu0 %479 }
 0x38b   : > { %487 = vadd.xlane.f32.xlu0 %v486_v28 }
 0x38c   : > { %v738_v36 = vpop.f32.mrb[4].mxu0 }
 0x38d   : > { %v1280_v38 = vpop.f32.mrb[5].mxu0  ;;  %v745_v44 = vmul.f32 %v738_v36, %v1450_v32 }
 0x38e   : > { %v741_v41 = vpop.f32.mrb[6].mxu0 }
 0x38f   : > { %v1281_v43 = vpop.f32.mrb[7].mxu0  ;;  %490 = vadd.xlane.f32.xlu0 %v489_v42  ;;  %v746_v46 = vmul.f32 %v741_v41, %v1448_v31  ;;  %v748_v29 = vsel %vm747_vm14, %v745_v44, 0.0  ;;  %v844_v41 = vrot.slane %v1536_v61, 4 }
 0x391   : > { %v751_v47 = vsel %vm747_vm14, %v746_v46, 0.0 }
 0x393   : > { %466 = vadd.xlane.f32.xlu0 %v465_v45 }
 0x397   : > { %749 = vadd.xlane.f32.xlu0 %v748_v29  ;;  %v845_v29 = vadd.f32 %v844_v41, %v1536_v61 }
 0x39b   : > { %752 = vadd.xlane.f32.xlu0 %v751_v47 }
 0x40c   : > { %v1574_v22 = vpop.xlane.xlu0 %945 }
 0x40d   : > { %950 = vxpose.xlu0.b32.start [1/2] (short) (narrow) %v1574_v22, 8 }
 0x410   : > { %v1577_v48 = vpop.xlane.xlu0 %948 }
 0x411   : > { %951 = vxpose.xlu0.b32.end [2/2] (short) (narrow) %v1577_v48, 8 }
 0x414   : > { %v483_v32 = vpop.xlane.xlu0 %482 }
 0x418   : > { %v488_v49 = vpop.xlane.xlu0 %487 }
 0x419   : > { %v492_v31 = vmul.f32 %v488_v49, %v480_v23  ;;  %v846_v49 = vrot.slane %v845_v29, 2 }
 0x41c   : > { %v491_v50 = vpop.xlane.xlu0 %490 }
 0x41d   : > { %v493_v51 = vmul.f32 %v491_v50, %v483_v32  ;;  %v847_v50 = vadd.f32 %v846_v49, %v845_v29 }
 0x41f   : > { %v496_v54 = vadd.f32 %v493_v51, %v492_v31  ;;  %v848_v31 = vrot.slane %v847_v50, 1 }
 0x420   : > { %v467_v55 = vpop.xlane.xlu0 %466 }
 0x421   : > { %v471_v56 = vadd.f32 %v470_v30, %v467_v55  ;;  %v497_v57 = vrot.slane %v496_v54, 4 }
 0x423   : > { %v472_v58 = vrot.slane %v471_v56, 4  ;;  %v498_v62 = vadd.f32 %v497_v57, %v496_v54  ;;  %v849_v54 = vadd.f32 %v848_v31, %v847_v50 }
 0x424   : > { %v750_v59 = vpop.xlane.xlu0 %749 }
 0x425   : > { %v473_v60 = vadd.f32 %v472_v58, %v471_v56  ;;  %v499_v33 = vrot.slane %v498_v62, 2 }
 0x427   : > { %v474_v63 = vrot.slane %v473_v60, 2  ;;  %v556_v0 = vpop.f32.mrb[0].mxu1  ;;  %v500_v34 = vadd.f32 %v499_v33, %v498_v62 }
 0x428   : > { %v753_v1 = vpop.xlane.xlu0 %752  ;;  %563 = vst.msk [vmem:[%s360_s21] sm:$0x3] %vm562_vm0, %v556_v0  ;;  %v1274_v2 = vpop.f32.mrb[1].mxu1 }
 0x429   : > { %v475_v3 = vadd.f32 %v474_v63, %v473_v60  ;;  %v754_v4 = vadd.f32 %v753_v1, %v750_v59  ;;  %v559_v6 = vpop.f32.mrb[2].mxu1  ;;  %v501_v20 = vrot.slane %v500_v34, 1 }
 0x42a   : > { %v1275_v7 = vpop.f32.mrb[3].mxu1 }
 0x42b   : > { %v755_v8 = vrot.slane %v754_v4, 4  ;;  %v476_v9 = vrot.slane %v475_v3, 1  ;;  %v502_v27 = vadd.f32 %v501_v20, %v500_v34 }
 0x42d   : > { %v756_v11 = vadd.f32 %v755_v8, %v754_v4  ;;  %v477_v15 = vadd.f32 %v476_v9, %v475_v3 }
 0x42f   : > { %v757_v13 = vrot.slane %v756_v11, 2  ;;  %v834_v17 = vpop.f32.mrb[4].mxu1  ;;  %v1026_v25 = vsel %vm1025_vm2, %v477_v15, 0.0 }
 0x430   : > { %840 = vst.msk [vmem:[%s364_s26] sm:$0xff] %vm747_vm14, %v834_v17  ;;  %v1286_v14 = vpop.f32.mrb[5].mxu1  ;;  %v1028_v5 = vsel %vm1027_vm4, %v502_v27, %v1026_v25 }
 0x431   : > { %v758_v18 = vadd.f32 %v757_v13, %v756_v11  ;;  %v837_v19 = vpop.f32.mrb[6].mxu1 }
 0x432   : > { %v1287_v21 = vpop.f32.mrb[7].mxu1 }
 0x433   : > { %v759_v24 = vrot.slane %v758_v18, 1 }
 0x435   : > { %v760_v26 = vadd.f32 %v759_v24, %v758_v18 }
 0x437   : > { %v780_v35 = vsub.f32 %v1542_v10, %v760_v26 }
 0x439   : > { %v1030_v28 = vsel %vm1029_vm5, %v780_v35, %v1028_v5 }
 0x43a   : > { %v1032_v16 = vsel %vm1031_vm6, %v1542_v10, %v1030_v28 }
 0x43b   : > { %1034 = vst.msk [vmem:[%s367_s29] sm:$0x1] %vm1033_vm7, %v1032_v16 }
 0x459   : > { %v1294_v36 = vpop.f32.mrb[8].mxu0 }
 0x45a   : > { %v933_v38 = vpop.f32.mrb[9].mxu0  ;;  %v989_v43 = vmul.f32 2.0, %v1294_v36 }
 0x45b   : > { %v988_v44 = vmul.f32 2.0, %v933_v38 }
 0x48d   : > { %v966_v40 = vpop.trf.xlu0 }
 0x48e   : > { %v985_v42 = vrot.slane %v966_v40, %v677_v39 }
 0x490   : > { %v986_v45 = vadd.f32 %v985_v42, %v1574_v22  ;;  %v987_v46 = vadd.f32 %v985_v42, %v1577_v48 }
 0x492   : > { %v990_v47 = vsub.f32 %v986_v45, %v988_v44  ;;  %v991_v23 = vsub.f32 %v987_v46, %v989_v43 }
 0x494   : > { %v992_v10 = vmax.f32 %v990_v47, 0.0  ;;  %v993_v32 = vmax.f32 %v991_v23, 0.0 }
 0x496   : > { %1337 = vrsqrt.f32 %v992_v10  ;;  %vm996_vm8 = vcmp.eq.f32.partialorder %v992_v10, inf  ;;  %v999_v22 = vand.u32 2147483648, %v992_v10  ;;  %vm998_vm9 = vcmp.eq.f32.partialorder %v992_v10, 0.0 }
 0x497   : > { %1339 = vrsqrt.f32 %v993_v32  ;;  %vm1003_vm10 = vcmp.eq.f32.partialorder %v993_v32, inf  ;;  %v1006_v61 = vand.u32 2147483648, %v993_v32  ;;  %vm1005_vm11 = vcmp.eq.f32.partialorder %v993_v32, 0.0 }
 0x4a0   : > { %v1338_v51 = vpop.eup %1337 }
 0x4a1   : > { %v1340_v37 = vpop.eup %1339  ;;  %v995_v39 = vmul.f32 %v1338_v51, %v992_v10 }
 0x4a2   : > { %v1002_v30 = vmul.f32 %v1340_v37, %v993_v32 }
 0x4a3   : > { %v997_v48 = vsel %vm996_vm8, %v992_v10, %v995_v39 }
 0x4a4   : > { %v1000_v55 = vsel %vm998_vm9, %v999_v22, %v997_v48  ;;  %v1004_v56 = vsel %vm1003_vm10, %v993_v32, %v1002_v30 }
 0x4a5   : > { %v1007_v57 = vsel %vm1005_vm11, %v1006_v61, %v1004_v56  ;;  %v1008_v58 = vmul.f32 %v1000_v55, %v849_v54 }
 0x4a6   : > { %v1009_v59 = vmul.f32 %v1007_v57, %v849_v54 }
 0x4a7   : > { %v1010_v60 = vmul.f32 %v1008_v58, %v1522_v53 }
 0x4a8   : > { %v1011_v62 = vmul.f32 %v1009_v59, %v1520_v52 }
 0x4a9   : > { %v1250_v63 = vpack.c.bf16 %v1010_v60, %v1010_v60 }
 0x4aa   : > { %v1251_v0 = vpack.c.bf16 %v1011_v62, %v1011_v62 }
 0x4ab   : > { %1021 = vst.msk [vmem:[%s356_s8] sm:$0xf] %vm1020_vm12, %v1250_v63 }
 0x4ac   : > { %1022 = vst.msk [vmem:[%s356_s8 + $0x4] sm:$0xf] %vm1020_vm12, %v1251_v0 }
 0x4ad PF: > { %s18_s24 = sadd.s32 1, %s1347_s24  }
 0x4ae   : > { %p15_p4 = scmp.ge.s32.totalorder %s18_s24, 4  }
 0x4b0   :  { %17 = sbr.rel (!%p15_p4) target bundleno = 1 (0x1), region = 111 }

// kernel: diffwire_forward.9
= control target key start
LH: loop header
LB: loop body
LE: loop exit
PB: predicated region body
PF: predicated region fallthrough
CT: control target
= control target key end

     0   :  { %s1288_s30 = smov 0   ;;  %s1444_s0 = inlined_call_operand.vmem [shape: bf16[2,16,16], index: 0, kind: input, shape index: {}]   ;;  %s1445_s1 = inlined_call_operand.vmem [shape: f32[2,16,32], index: 1, kind: input, shape index: {}]   ;;  %s1446_s2 = inlined_call_operand.vmem [shape: f32[2,16,16], index: 2, kind: input, shape index: {}]   ;;  %s1447_s3 = inlined_call_operand.vmem [shape: f32[2,16,1], index: 3, kind: input, shape index: {}]   ;;  %s1448_s4 = inlined_call_operand.vmem [shape: f32[32,32], index: 4, kind: input, shape index: {}]   ;;  %s1449_s5 = inlined_call_operand.vmem [shape: f32[1,32], index: 5, kind: input, shape index: {}]   ;;  %s1450_s6 = inlined_call_operand.vmem [shape: f32[32,32], index: 6, kind: input, shape index: {}]   ;;  %s1451_s7 = inlined_call_operand.vmem [shape: f32[2,1,32], index: 7, kind: output, shape index: {0}]   ;;  %s1452_s8 = inlined_call_operand.vmem [shape: f32[2,16,16], index: 8, kind: output, shape index: {1}]   ;;  %s1453_s9 = inlined_call_operand.vmem [shape: f32[2,1,2], index: 9, kind: output, shape index: {2}]  }
   0x1 LB: > { %s1095_s10 = sadd.s32 4294967295, %s1233_s30   ;;  %p1099_p0 = scmp.ge.s32.totalorder %s1233_s30, 1  ;;  %s1233_s30 = sphi %s1288_s30, %s20_s30  }
   0x2   : > { %p322_p1 = scmp.lt.s32.totalorder %s1233_s30, 3 }
   0x4   : > { %p323_p2 = pnand %p1099_p0, %p322_p1 }
   0x5   : > { %p379_p3 = scmp.lt.s32.totalorder (!%p323_p2), %s1095_s10, 1  ;;  %vm431_vm0 = vcmask (!%p323_p2), 130048   ;;  %v1235_v4 = vmov (!%p323_p2), 0   ;;  %v1236_v17 = vmov (!%p323_p2), 0.0   ;;  %vm1237_vm1 = vmmov (!%p323_p2), 0  }
   0x6   : > { %326 = sbr.rel (%p323_p2) target bundleno = 1654 (0x676), region = 48  ;;  %1205 = vset.pattern.permute.xlu0 (!%p323_p2), %v1235_v4  ;;  %1206 = vset.pattern.permute.xlu1 (!%p323_p2), %v1235_v4  ;;  %v694_v50 = vlaneseq (!%p323_p2)  ;;  %vm700_vm10 = vcmask (!%p323_p2), 8192   ;;  %vm834_vm11 = vcmask (!%p323_p2), 261120   ;;  %vm952_vm12 = vcmask (!%p323_p2), 253952  }
   0x7   : > { %1142 = vmatprep.subr.bf16.mxu0 (!%p323_p2), %v1236_v17  ;;  %1160 = vmatprep.subr.bf16.mxu1 (!%p323_p2), %v1236_v17 }
   0x8   : > { %1144 = vmatprep.mubr.msk.bf16.mxu0 (!%p323_p2), %vm1237_vm1, %v1236_v17  ;;  %1162 = vmatprep.mubr.msk.bf16.mxu1 (!%p323_p2), %vm1237_vm1, %v1236_v17  ;;  %v1358_v51 = vshrl.u32 (!%p323_p2), %v694_v50, 7  ;;  %v1360_v52 = vand.u32 (!%p323_p2), 127, %v694_v50 }
   0xa   : > { %v704_v53 = vadd.s32 (!%p323_p2), 8, %v1358_v51  ;;  %vm705_vm2 = vcmp.eq.s32.totalorder (!%p323_p2), %v1358_v51, %v1360_v52  ;;  %vm696_vm8 = vcmp.eq.s32.totalorder (!%p323_p2), %v1360_v52, 0  ;;  %vm698_vm9 = vcmp.eq.s32.totalorder (!%p323_p2), %v1360_v52, 1 }
   0xc   : > { %vm706_vm3 = vcmp.eq.s32.totalorder (!%p323_p2), %v704_v53, %v1360_v52  ;;  %v822_v52 = vld [vmem:[%s1448_s4 + $0x10] sm:$0xff] (!%p323_p2) }
   0xd   : > { %s1455_s10 = smov (!%p379_p3, %s1095_s10), 1 }
   0xe   : > { %s1299_s11 = sshll.u32 %s1455_s10, 4  ;;  %s1121_s21 = sshll.u32 %s1455_s10, 3 }
   0xf   : > { %s393_s14 = scalar_lea.vmem %s1446_s2, %s1299_s11  ;;  %s398_s17 = scalar_lea.vmem %s1447_s3, %s1299_s11 }
  0x10   : > { %v429_v0 = vld [vmem:[%s393_s14] sm:$0xff]  ;;  %v430_v1 = vld [vmem:[%s393_s14 + $0x8] sm:$0xff]  ;;  %s388_s20 = scalar_lea.vmem %s1445_s1, %s1299_s11  ;;  %s383_s24 = scalar_lea.vmem %s1444_s0, %s1121_s21 }
  0x11   : > { %v432_v2 = vsel %vm431_vm0, %v429_v0, -inf  ;;  %v435_v3 = vsel %vm431_vm0, %v430_v1, -inf  ;;  %v413_v5 = vld [vmem:[%s398_s17] sm:$0xff]  ;;  %v414_v16 = vld [vmem:[%s398_s17 + $0x8] sm:$0xff]  ;;  %s406_s27 = scalar_lea.vmem %s1452_s8, %s1299_s11  ;;  %s409_s11 = scalar_lea.vmem %s1453_s9, %s1455_s10 }
  0x12   : > { %433 = vmax.xlane.f32.xlu0 %v432_v2  ;;  %v415_v20 = vld [vmem:[%s388_s20] sm:$0xff]  ;;  %v416_v22 = vld [vmem:[%s388_s20 + $0x8] sm:$0xff]  ;;  %s401_s13 = scalar_lea.vmem %s1451_s7, %s1455_s10 }
  0x13   : > { %v411_v35 = vld [vmem:[%s383_s24] sm:$0xff]  }
  0x14   : > { %v624_v55 = vunpack.c.l.bf16 %v411_v35 }
  0x16   : > { %436 = vmax.xlane.f32.xlu0 %v435_v3  ;;  %v626_v63 = vsel %vm431_vm0, %v624_v55, 0.0  ;;  %v823_v55 = vld [vmem:[%s1448_s4 + $0x18] sm:$0xff] }
  0x2c   : > { %419 = vperm.xlu0 %1205, %v413_v5  }
  0x9f   : > { %v434_v6 = vpop.xlane.xlu0 %433 }
  0xa0   : > { %v438_v7 = vsub.f32 %v429_v0, %v434_v6  ;;  %v625_v0 = vunpack.c.h.bf16 %v411_v35 }
  0xa2   : > { %v440_v8 = vmul.f32 1.442695, %v438_v7 }
  0xa3   : > { %v437_v9 = vpop.xlane.xlu0 %436 }
  0xa4   : > { %1209 = vpow2.f32 %v440_v8  ;;  %v439_v10 = vsub.f32 %v430_v1, %v437_v9  ;;  %v629_v1 = vsel %vm431_vm0, %v625_v0, 0.0 }
  0xa6   : > { %v442_v11 = vmul.f32 1.442695, %v439_v10 }
  0xa8   : > { %1211 = vpow2.f32 %v442_v11 }
  0xab   : > { %v420_v21 = vpop.permute.xlu0 %419 }
  0xac   : > { %v427_v23 = vmul.f32 %v420_v21, %v415_v20 }
  0xae   : > { %v1210_v12 = vpop.eup %1209 }
  0xaf   : > { %v444_v13 = vsel %vm431_vm0, %v1210_v12, 0.0 }
  0xb0   : > { %445 = vadd.xlane.f32.xlu1 %v444_v13 }
  0xb2   : > { %v1212_v14 = vpop.eup %1211 }
  0xb3   : > { %v447_v15 = vsel %vm431_vm0, %v1212_v14, 0.0 }
  0xb4   : > { %448 = vadd.xlane.f32.xlu1 %v447_v15 }
  0xc5   : > { %424 = vperm.xlu1 %1206, %v414_v16  }
 0x13d   : > { %v446_v18 = vpop.xlane.xlu1 %445 }
 0x13e   : > { %1213 = vrcp.f32 %v446_v18 }
 0x141   : > { %v449_v19 = vpop.xlane.xlu1 %448 }
 0x142   : > { %1215 = vrcp.f32 %v449_v19 }
 0x145   : > { %v425_v24 = vpop.permute.xlu1 %424 }
 0x146   : > { %v428_v25 = vmul.f32 %v425_v24, %v416_v22 }
 0x148   : > { %v1214_v26 = vpop.eup %1213  ;;  %v457_v27 = vpack.c.bf16 %v428_v25, %v427_v23 }
 0x149   : > { %v451_v28 = vmul.f32 %v1214_v26, %v1210_v12 }
 0x14a   : > { %1143 = vmatpush3.bf16.msra.mxu0 %v457_v27 }
 0x14b   : > { %1148 = vmatprep.subr.bf16.mxu0 %v1236_v17  ;;  %v1324_v31 = vmul.f32 %v451_v28, %v420_v21 }
 0x14c   : > { %v1216_v29 = vpop.eup %1215 }
 0x14d   : > { %v453_v30 = vmul.f32 %v1216_v29, %v1212_v14  ;;  %v632_v2 = vmul.f32 %v1324_v31, %v1324_v31 }
 0x14f   : > { %v1326_v32 = vmul.f32 %v453_v30, %v425_v24  ;;  %v634_v3 = vsel %vm431_vm0, %v632_v2, 0.0 }
 0x151   : > { %v456_v33 = vpack.c.bf16 %v1326_v32, %v1324_v31  ;;  %v633_v4 = vmul.f32 %v1326_v32, %v1326_v32 }
 0x153   : > { %458 = vxpose.xlu1.c.b16.start.end [1/1] (short) (narrow) %v456_v33, 16  ;;  %1161 = vmatpush3.bf16.msra.mxu1 %v456_v33  ;;  %v637_v6 = vsel %vm431_vm0, %v633_v4, 0.0 }
 0x154   : > { %1172 = vmatprep.subr.bf16.mxu1 %v1236_v17 }
 0x1b9   : > { %v466_v34 = vpop.trf.xlu1 }
 0x1ba   : > { %1145 = vmatmul.mubr.msk.bf16.vlgmr.msra.gmra.mrb[0].mxu0 %vm431_vm0, %v466_v34  ;;  %1163 = vmatmul.mubr.msk.bf16.vlgmr.msra.gmra.mrb[0].mxu1 %vm431_vm0, %v466_v34 }
 0x1bb   : > { %1149 = vmatpush3.bf16.msra.mxu0 %v456_v33  ;;  %1150 = vmatprep.mubr.msk.bf16.mxu0 %vm1237_vm1, %v1236_v17 }
 0x1bc   : > { %1154 = vmatprep.subr.bf16.mxu0 %v1236_v17  ;;  %1176 = vmatprep.mubr.msk.bf16.mxu1 %vm1237_vm1, %v1236_v17 }
 0x1c2   : > { %1151 = vmatmul.mubr.msk.bf16.vlgmr.msra.gmra.mrb[4].mxu0 %vm431_vm0, %v411_v35 }
 0x1c3   : > { %1156 = vmatprep.mubr.msk.bf16.mxu0 %vm1237_vm1, %v1236_v17 }
 0x28d   : > { %v511_v36 = vpop.f32.mrb[0].mxu0  ;;  %v685_v37 = vpop.f32.mrb[0].mxu1 }
 0x28e   : > { %692 = vst.msk [vmem:[%s406_s27] sm:$0xff] %vm431_vm0, %v685_v37  ;;  %v1146_v38 = vpop.f32.mrb[1].mxu0  ;;  %v1164_v39 = vpop.f32.mrb[1].mxu1 }
 0x28f   : > { %v514_v40 = vpop.f32.mrb[2].mxu0  ;;  %v688_v41 = vpop.f32.mrb[2].mxu1 }
 0x290   : > { %v1350_v42 = vpack.c.bf16 %v514_v40, %v511_v36  ;;  %693 = vst.msk [vmem:[%s406_s27 + $0x8] sm:$0xff] %vm431_vm0, %v688_v41  ;;  %v1147_v43 = vpop.f32.mrb[3].mxu0  ;;  %v1165_v44 = vpop.f32.mrb[3].mxu1 }
 0x295   : > { %v560_v45 = vpop.f32.mrb[4].mxu0 }
 0x296   : > { %v1152_v46 = vpop.f32.mrb[5].mxu0  ;;  %v609_v5 = vmul.f32 %v560_v45, %v1324_v31 }
 0x297   : > { %v563_v47 = vpop.f32.mrb[6].mxu0 }
 0x298   : > { %v567_v48 = vpack.c.bf16 %v563_v47, %v560_v45  ;;  %v1153_v49 = vpop.f32.mrb[7].mxu0  ;;  %v610_v7 = vmul.f32 %v563_v47, %v1326_v32  ;;  %v611_v8 = vsel %vm431_vm0, %v609_v5, 0.0 }
 0x299   : > { %v821_v49 = vld [vmem:[%s1448_s4 + $0x8] sm:$0xff] }
 0x29a   : > { %1155 = vmatpush3.bf16.msra.mxu0 %v567_v48  ;;  %v614_v9 = vsel %vm431_vm0, %v610_v7, 0.0  ;;  %v820_v48 = vld [vmem:[%s1448_s4] sm:$0xff] }
 0x29b   : > { %1166 = vmatprep.subr.bf16.mxu0 %v1236_v17  ;;  %v825_v53 = vpack.c.bf16 %v821_v49, %v820_v48 }
 0x29d   : > { %1157 = vmatmul.mubr.msk.bf16.vlgmr.msra.gmra.mrb[8].mxu0 %vm431_vm0, %v466_v34 }
 0x29e   : > { %1167 = vmatpush3.bf16.msra.mxu0 %v1350_v42  ;;  %1168 = vmatprep.mubr.msk.bf16.mxu0 %vm1237_vm1, %v1236_v17 }
 0x370   : > { %v602_v54 = vpop.f32.mrb[8].mxu0 }
 0x371   : > { %v1366_v56 = vsel %vm705_vm2, 0.0, %v602_v54  ;;  %v1158_v57 = vpop.f32.mrb[9].mxu0 }
 0x372   : > { %v605_v58 = vpop.f32.mrb[10].mxu0  ;;  %v709_v59 = vsel %vm431_vm0, %v1366_v56, 0.0  ;;  %v839_v57 = vsel %vm834_vm11, %v825_v53, 0 }
 0x373   : > { %v1370_v60 = vsel %vm706_vm3, 0.0, %v605_v58  ;;  %710 = vadd.xlane.f32.xlu0 %v709_v59  ;;  %v1159_v61 = vpop.f32.mrb[11].mxu0  ;;  %1173 = vmatpush3.bf16.xpose.msra.mxu1 %v839_v57  ;;  %v826_v58 = vpack.c.bf16 %v823_v55, %v822_v52 }
 0x374   : > { %v712_v62 = vsel %vm431_vm0, %v1370_v60, 0.0  ;;  %1174 = vmatprep.subr.bf16.mxu1 %v1236_v17  ;;  %v765_v61 = vsub.s32 0, %v1358_v51  ;;  %v885_v51 = vld [vmem:[%s1450_s6] sm:$0xff] }
 0x375   : > { %713 = vadd.xlane.f32.xlu1 %v712_v62  ;;  %v842_v59 = vsel %vm834_vm11, %v826_v58, 0 }
 0x377   : > { %627 = vadd.xlane.f32.xlu0 %v626_v63 }
 0x37b   : > { %630 = vadd.xlane.f32.xlu0 %v629_v1  ;;  %1175 = vmatpush3.bf16.xpose.msra.mxu1 %v842_v59 }
 0x37c   : > { %1180 = vmatprep.subr.bf16.mxu1 %v1236_v17 }
 0x37f   : > { %635 = vadd.xlane.f32.xlu0 %v634_v3 }
 0x383   : > { %638 = vadd.xlane.f32.xlu0 %v637_v6 }
 0x387   : > { %612 = vadd.xlane.f32.xlu0 %v611_v8  ;;  %v886_v8 = vld [vmem:[%s1450_s6 + $0x8] sm:$0xff] }
 0x38b   : > { %615 = vadd.xlane.f32.xlu0 %v614_v9  ;;  %v889_v9 = vpack.c.bf16 %v886_v8, %v885_v51 }
 0x400   : > { %v711_v10 = vpop.xlane.xlu0 %710 }
 0x401   : > { %1217 = vrsqrt.f32 %v711_v10  ;;  %vm717_vm4 = vcmp.eq.f32.partialorder %v711_v10, inf  ;;  %v720_v19 = vand.u32 2147483648, %v711_v10  ;;  %vm719_vm5 = vcmp.eq.f32.partialorder %v711_v10, 0.0 }
 0x402   : > { %v714_v11 = vpop.xlane.xlu1 %713 }
 0x403   : > { %1219 = vrsqrt.f32 %v714_v11  ;;  %vm724_vm6 = vcmp.eq.f32.partialorder %v714_v11, inf  ;;  %v727_v22 = vand.u32 2147483648, %v714_v11  ;;  %vm726_vm7 = vcmp.eq.f32.partialorder %v714_v11, 0.0 }
 0x404   : > { %v628_v12 = vpop.xlane.xlu0 %627 }
 0x408   : > { %v631_v13 = vpop.xlane.xlu0 %630 }
 0x40b   : > { %v1218_v14 = vpop.eup %1217 }
 0x40c   : > { %v716_v15 = vmul.f32 %v1218_v14, %v711_v10  ;;  %v636_v16 = vpop.xlane.xlu0 %635  ;;  %v887_v14 = vld [vmem:[%s1450_s6 + $0x10] sm:$0xff] }
 0x40d   : > { %v1220_v18 = vpop.eup %1219  ;;  %v640_v27 = vmul.f32 %v636_v16, %v628_v12 }
 0x40e   : > { %v723_v20 = vmul.f32 %v1220_v18, %v714_v11  ;;  %v718_v21 = vsel %vm717_vm4, %v711_v10, %v716_v15  ;;  %v888_v15 = vld [vmem:[%s1450_s6 + $0x18] sm:$0xff] }
 0x40f   : > { %v721_v23 = vsel %vm719_vm5, %v720_v19, %v718_v21  ;;  %v890_v16 = vpack.c.bf16 %v888_v15, %v887_v14  ;;  %v1116_v19 = vld [vmem:[%s1449_s5] ss:$0 sm:$0xff] }
 0x410   : > { %v725_v24 = vsel %vm724_vm6, %v714_v11, %v723_v20  ;;  %v639_v25 = vpop.xlane.xlu0 %638  ;;  %v729_v26 = vadd.f32 1e-15, %v721_v23 }
 0x411   : > { %v641_v28 = vmul.f32 %v639_v25, %v631_v13  ;;  %v728_v29 = vsel %vm726_vm7, %v727_v22, %v725_v24  ;;  %v895_v13 = vsel %vm834_vm11, %v889_v9, 0  ;;  %v898_v18 = vsel %vm834_vm11, %v890_v16, 0 }
 0x412   : > { %731 = vxpose.xlu1.b32.start [1/2] (short) (narrow) %v729_v26, 8  ;;  %v730_v32 = vadd.f32 1e-15, %v728_v29 }
 0x413   : > { %v644_v30 = vadd.f32 %v641_v28, %v640_v27 }
 0x414   : > { %v613_v31 = vpop.xlane.xlu0 %612 }
 0x415   : > { %v645_v33 = vrot.slane %v644_v30, 4 }
 0x416   : > { %732 = vxpose.xlu1.b32.end [2/2] (short) (narrow) %v730_v32, 8 }
 0x417   : > { %v646_v34 = vadd.f32 %v645_v33, %v644_v30 }
 0x418   : > { %v616_v35 = vpop.xlane.xlu0 %615 }
 0x419   : > { %v617_v36 = vadd.f32 %v616_v35, %v613_v31  ;;  %v647_v37 = vrot.slane %v646_v34, 2 }
 0x41b   : > { %v618_v38 = vrot.slane %v617_v36, 4  ;;  %v648_v40 = vadd.f32 %v647_v37, %v646_v34 }
 0x41d   : > { %v619_v39 = vadd.f32 %v618_v38, %v617_v36  ;;  %v649_v44 = vrot.slane %v648_v40, 1 }
 0x41f   : > { %v620_v41 = vrot.slane %v619_v39, 2  ;;  %v650_v47 = vadd.f32 %v649_v44, %v648_v40 }
 0x421   : > { %v621_v43 = vadd.f32 %v620_v41, %v619_v39 }
 0x423   : > { %v622_v45 = vrot.slane %v621_v43, 1 }
 0x425   : > { %v623_v46 = vadd.f32 %v622_v45, %v621_v43 }
 0x427   : > { %v697_v50 = vsel %vm696_vm8, %v623_v46, 0.0 }
 0x428   : > { %v699_v54 = vsel %vm698_vm9, %v650_v47, %v697_v50 }
 0x429   : > { %701 = vst.msk [vmem:[%s409_s11] sm:$0x1] %vm700_vm10, %v699_v54 }
 0x492   : > { %v747_v62 = vpop.trf.xlu1 }
 0x493   : > { %v766_v63 = vrot.slane %v747_v62, %v765_v61 }
 0x495   : > { %1221 = vrcp.f32 %v766_v63 }
 0x496   : > { %1223 = vrcp.f32 %v729_v26 }
 0x497   : > { %1225 = vrcp.f32 %v730_v32 }
 0x49f   : > { %v1222_v0 = vpop.eup %1221 }
 0x4a0   : > { %v1224_v1 = vpop.eup %1223  ;;  %v768_v2 = vmul.f32 %v1222_v0, %v1366_v56  ;;  %v769_v3 = vmul.f32 %v1222_v0, %v1370_v60 }
 0x4a1   : > { %v1226_v4 = vpop.eup %1225 }
 0x4a2   : > { %v771_v5 = vmul.f32 %v1224_v1, %v768_v2  ;;  %v773_v6 = vmul.f32 %v1226_v4, %v769_v3 }
 0x4a4   : > { %v774_v7 = vpack.c.bf16 %v773_v6, %v771_v5 }
 0x4a6   : > { %1169 = vmatmul.mubr.msk.bf16.vlgmr.msra.gmra.mrb[12].mxu0 %vm431_vm0, %v774_v7 }
 0x579   : > { %v813_v10 = vpop.f32.mrb[12].mxu0 }
 0x57a   : > { %v1170_v11 = vpop.f32.mrb[13].mxu0 }
 0x57b   : > { %v816_v56 = vpop.f32.mrb[14].mxu0 }
 0x57c   : > { %v824_v12 = vpack.c.bf16 %v816_v56, %v813_v10  ;;  %v1171_v60 = vpop.f32.mrb[15].mxu0 }
 0x57e   : > { %1177 = vmatmul.mubr.msk.bf16.vlgmr.msra.gmra.mrb[4].mxu1 %vm834_vm11, %v824_v12 }
 0x57f   : > { %1181 = vmatpush3.bf16.xpose.msra.mxu1 %v895_v13  ;;  %1184 = vmatprep.mubr.msk.bf16.mxu1 %vm1237_vm1, %v1236_v17 }
 0x580   : > { %1182 = vmatprep.subr.bf16.mxu1 %v1236_v17 }
 0x587   : > { %1183 = vmatpush3.bf16.xpose.msra.mxu1 %v898_v18 }
 0x58e   : > { %1185 = vmatmul.mubr.msk.bf16.vlgmr.msra.gmra.mrb[4].mxu1 %vm834_vm11, %v1350_v42 }
 0x661   : > { %v934_v20 = vpop.f32.mrb[4].mxu1 }
 0x662   : > { %v1188_v21 = vadd.f32 %v1116_v19, %v934_v20  ;;  %v1186_v22 = vpop.f32.mrb[5].mxu1 }
 0x663   : > { %v937_v23 = vpop.f32.mrb[6].mxu1 }
 0x664   : > { %v1189_v24 = vadd.f32 %v1116_v19, %v937_v23  ;;  %v1187_v25 = vpop.f32.mrb[7].mxu1  ;;  %v943_v17 = vsel %vm834_vm11, %v1188_v21, 0.0 }
 0x666   : > { %v944_v26 = vsel %vm834_vm11, %v1189_v24, 0.0 }
 0x667   : > { %v945_v27 = vadd.f32 %v944_v26, %v943_v17 }
 0x669   : > { %v946_v28 = vrot.slane %v945_v27, 4 }
 0x66b   : > { %v947_v29 = vadd.f32 %v946_v28, %v945_v27 }
 0x66d   : > { %v948_v30 = vrot.slane %v947_v29, 2 }
 0x66f   : > { %v949_v42 = vadd.f32 %v948_v30, %v947_v29 }
 0x671   : > { %v950_v31 = vrot.slane %v949_v42, 1 }
 0x673   : > { %v951_v32 = vadd.f32 %v950_v31, %v949_v42 }
 0x675   : > { %953 = vst.msk [vmem:[%s401_s13] sm:$0x1] %vm952_vm12, %v951_v32 }
 0x676 PF: > { %s20_s30 = sadd.s32 1, %s1233_s30  }
 0x677   : > { %p17_p4 = scmp.ge.s32.totalorder %s20_s30, 4  }
 0x679   :  { %19 = sbr.rel (!%p17_p4) target bundleno = 1 (0x1), region = 111 }

</bundles_post_ra>
